<compile_context>
chip_gen: v7x
topology: tpu7x:2x2x1
jax: 0.10.0
libtpu: 0.0.40
codegen_flags: <defaults>
</compile_context>

<pallas_src>
import math
import functools

import jax
import jax.numpy as jnp
from jax import lax
from jax.experimental import pallas as pl
from jax.experimental.pallas import tpu as pltpu


# ----------------------------- Kernel 1: QKV ------------------------------- #
def _qkv_proj_kernel(x_ref, wqkv_ref, q_ref, k_ref, v_ref, *, hd):
    # x_ref: (tq, d_in) bf16; wqkv_ref: (H, d_in, 3*hd) bf16 (VMEM-resident).
    h = pl.program_id(2)
    x = x_ref[...]
    w = wqkv_ref[h]                                              # (d_in, 3*hd)
    y = jnp.dot(x, w, preferred_element_type=jnp.float32)        # (tq, 3*hd)
    # Q columns were pre-scaled by 1/sqrt(hd) on the host.
    q_ref[...] = y[:, 0 * hd:1 * hd].astype(q_ref.dtype)
    k_ref[...] = y[:, 1 * hd:2 * hd].astype(k_ref.dtype)
    v_ref[...] = y[:, 2 * hd:3 * hd].astype(v_ref.dtype)


# ----------------------- Kernel 2: flash attention ------------------------- #
def _flash_attn_kernel(q_ref, k_ref, v_ref, o_ref, m_sc, l_sc, acc_sc, *,
                       tq, tk, exp_dtype):
    qi = pl.program_id(2)
    ki = pl.program_id(3)
    q_start = qi * tq
    kv_start = ki * tk

    @pl.when(ki == 0)
    def _():
        # NOTE: -1e30 sentinel is safe for pure causal attention (diagonal is
        # always unmasked); revisit if padding/segment masks are added.
        m_sc[...] = jnp.full(m_sc.shape, -1e30, dtype=m_sc.dtype)
        l_sc[...] = jnp.zeros(l_sc.shape, dtype=l_sc.dtype)
        acc_sc[...] = jnp.zeros(acc_sc.shape, dtype=acc_sc.dtype)

    def flash_step(apply_mask):
        q = q_ref[...]                                   # (tq, hd) bf16, pre-scaled
        k = k_ref[...]                                   # (tk, hd) bf16
        s = lax.dot_general(q, k, (((1,), (1,)), ((), ())),
                            preferred_element_type=jnp.float32)  # (tq, tk) f32
        if apply_mask:  # only diagonal tiles pay for the iota/compare/select
            rows = q_start + lax.broadcasted_iota(jnp.int32, (tq, tk), 0)
            cols = kv_start + lax.broadcasted_iota(jnp.int32, (tq, tk), 1)
            s = jnp.where(cols <= rows, s, jnp.float32(-1e30))
        m_prev = m_sc[...]
        m_new = jnp.maximum(m_prev, jnp.max(s, axis=-1, keepdims=True))
        alpha = jnp.exp(m_prev - m_new)                  # (tq, 1) f32 (cheap)
        # Big exp in bf16 on v6e/v7x (bf16 EUP); f32 on v5e.  p is consumed in
        # bf16 by the PV matmul anyway; l/acc state stays f32.
        p = jnp.exp((s - m_new).astype(exp_dtype))
        l_sc[...] = alpha * l_sc[...] + jnp.sum(
            p.astype(jnp.float32), axis=-1, keepdims=True)
        acc_sc[...] = alpha * acc_sc[...] + jnp.dot(
            p.astype(v_ref.dtype), v_ref[...],
            preferred_element_type=jnp.float32)
        m_sc[...] = m_new

    # Causal tiling: skip tiles fully above the diagonal, mask only diagonals.
    not_skipped = kv_start <= q_start + (tq - 1)
    needs_mask = kv_start + (tk - 1) > q_start

    @pl.when(jnp.logical_and(not_skipped, needs_mask))
    def _():
        flash_step(True)

    @pl.when(jnp.logical_and(not_skipped, jnp.logical_not(needs_mask)))
    def _():
        flash_step(False)

    @pl.when(ki == pl.num_programs(3) - 1)
    def _():
        # approx reciprocal on the EUP; fine for inference (switch to exact for
        # training / tight-tolerance eval).
        inv_l = pl.reciprocal(l_sc[...], approx=True)
        o_ref[...] = (acc_sc[...] * inv_l).astype(o_ref.dtype)


# ----------------------- Kernel 3: output projection ----------------------- #
def _out_proj_kernel(ctx_ref, wo_ref, bo_ref, o_ref, acc_ref, *, num_heads):
    # ctx_ref: (H, tq, hd); wo_ref: (H, hd, d_out) resident; bo_ref: (1, d_out).
    # Unrolled per-head MXU accumulation into a single VMEM f32 accumulator.
    acc_ref[...] = jnp.dot(ctx_ref[0], wo_ref[0],
                           preferred_element_type=jnp.float32)
    for h in range(1, num_heads):
        acc_ref[...] += jnp.dot(ctx_ref[h], wo_ref[h],
                                preferred_element_type=jnp.float32)
    o_ref[...] = (acc_ref[...] + bo_ref[...]).astype(o_ref.dtype)


# --------------------------------- helpers --------------------------------- #
def _choose_tile(n, preferred):
    for t in (preferred, 512, 256, 128, 64, 32, 16, 8):
        if t <= n and n % t == 0:
            return t
    return n


def _bf16_eup_available():
    # bf16 exp only helps on chips with a bf16 EUP (v6e / v7x); on v5e it would
    # be promoted back to f32 and just add cast traffic.
    try:
        kind = jax.devices()[0].device_kind.lower()
    except Exception:
        return False
    return ("v6" in kind) or ("v7" in kind) or ("7x" in kind)


# --------------------------------- wrapper --------------------------------- #
def multi_head_attention(x, w_query, w_key, w_value, w_out, b_out, num_heads,
                         *, dropout=0.0, q_tile=256, kv_tile=256):
    # TODO(synk): training-mode dropout on the attention weights is not
    # implemented (nn.Dropout is identity in eval / inference).
    B, T, d_in = x.shape
    d_out = w_query.shape[1]
    assert d_out % num_heads == 0, "d_out must be divisible by num_heads"
    H = num_heads
    hd = d_out // H
    assert hd % 8 == 0, "head_dim must be a multiple of 8 for TPU tiling"
    assert T % 8 == 0

    tq = _choose_tile(T, q_tile)
    tk = _choose_tile(T, kv_tile)
    n_q, n_kv = T // tq, T // tk

    scale = 1.0 / math.sqrt(hd)
    mxu_dtype = jnp.bfloat16
    exp_dtype = jnp.bfloat16 if _bf16_eup_available() else jnp.float32

    # One-time layout prep (in a real model this is pre-folded into the
    # checkpoint layout): fused per-head [Q|K|V] slab (Q pre-scaled), per-head
    # W_out row-slabs, bf16 MXU operands.
    x_b = x.astype(mxu_dtype)
    wq3 = w_query.reshape(d_in, H, hd) * scale
    wk3 = w_key.reshape(d_in, H, hd)
    wv3 = w_value.reshape(d_in, H, hd)
    wqkv = jnp.concatenate([wq3, wk3, wv3], axis=-1)          # (d_in, H, 3*hd)
    wqkv = wqkv.transpose(1, 0, 2).astype(mxu_dtype)          # (H, d_in, 3*hd)
    wo_r = w_out.reshape(H, hd, d_out).astype(mxu_dtype)      # (H, hd, d_out)
    bo_r = b_out.reshape(1, d_out).astype(jnp.float32)

    # ---- Kernel 1: fused QKV projection -> (B, H, T, hd), Q pre-scaled.
    qkv_shape = jax.ShapeDtypeStruct((B, H, T, hd), mxu_dtype)
    q, k, v = pl.pallas_call(
        functools.partial(_qkv_proj_kernel, hd=hd),
        out_shape=(qkv_shape, qkv_shape, qkv_shape),
        grid_spec=pltpu.PrefetchScalarGridSpec(
            num_scalar_prefetch=0,
            grid=(B, n_q, H),
            in_specs=[
                pl.BlockSpec((None, tq, d_in), lambda b, qi, h: (b, qi, 0)),
                # Full fused weight slab, constant block index -> DMA'd once,
                # stays VMEM-resident for the whole grid (~3.4 MiB bf16 at
                # d_model=768; re-tile per head for d_model >= ~2048 on v7x).
                pl.BlockSpec((H, d_in, 3 * hd), lambda b, qi, h: (0, 0, 0)),
            ],
            out_specs=[
                pl.BlockSpec((None, None, tq, hd),
                             lambda b, qi, h: (b, h, qi, 0)),
                pl.BlockSpec((None, None, tq, hd),
                             lambda b, qi, h: (b, h, qi, 0)),
                pl.BlockSpec((None, None, tq, hd),
                             lambda b, qi, h: (b, h, qi, 0)),
            ],
        ),
        compiler_params=pltpu.CompilerParams(
            dimension_semantics=("parallel", "parallel", "arbitrary"),
            vmem_limit_bytes=32 * 1024 * 1024),
    )(x_b, wqkv)

    # ---- Kernel 2: flash attention core -> per-head context (B, H, T, hd).
    def _kv_block(qi, ki):
        # Clamp the kv block index for causally skipped tiles so the (already
        # compute-skipped) steps alias the previous block: no new K/V DMA.
        return jnp.minimum(ki, (qi * tq + tq - 1) // tk)

    ctx = pl.pallas_call(
        functools.partial(_flash_attn_kernel, tq=tq, tk=tk,
                          exp_dtype=exp_dtype),
        out_shape=jax.ShapeDtypeStruct((B, H, T, hd), mxu_dtype),
        grid_spec=pltpu.PrefetchScalarGridSpec(
            num_scalar_prefetch=0,
            grid=(B, H, n_q, n_kv),
            in_specs=[
                pl.BlockSpec((None, None, tq, hd),
                             lambda b, h, qi, ki: (b, h, qi, 0)),
                pl.BlockSpec((None, None, tk, hd),
                             lambda b, h, qi, ki: (b, h, _kv_block(qi, ki), 0)),
                pl.BlockSpec((None, None, tk, hd),
                             lambda b, h, qi, ki: (b, h, _kv_block(qi, ki), 0)),
            ],
            out_specs=pl.BlockSpec((None, None, tq, hd),
                                   lambda b, h, qi, ki: (b, h, qi, 0)),
            scratch_shapes=[
                pltpu.VMEM((tq, 1), jnp.float32),   # running max m
                pltpu.VMEM((tq, 1), jnp.float32),   # running denom l
                pltpu.VMEM((tq, hd), jnp.float32),  # output accumulator
            ],
        ),
        # B, H lead as parallel axes so v7x megacore sharding stays balanced
        # (qi has triangular causal work); kv axis is the accumulation axis.
        compiler_params=pltpu.CompilerParams(
            dimension_semantics=("parallel", "parallel", "parallel",
                                 "arbitrary")),
    )(q, k, v)

    # ---- Kernel 3: output projection — all heads per step, W_out resident,
    #      lane-dense (tq, d_out) output tiles.
    # TODO(synk): for very large d_out, tile the output feature dim as well.
    out = pl.pallas_call(
        functools.partial(_out_proj_kernel, num_heads=H),
        out_shape=jax.ShapeDtypeStruct((B, T, d_out), x.dtype),
        grid_spec=pltpu.PrefetchScalarGridSpec(
            num_scalar_prefetch=0,
            grid=(B, n_q),
            in_specs=[
                pl.BlockSpec((None, H, tq, hd), lambda b, qi: (b, 0, qi, 0)),
                pl.BlockSpec((H, hd, d_out), lambda b, qi: (0, 0, 0)),  # resident
                pl.BlockSpec((1, d_out), lambda b, qi: (0, 0)),         # resident
            ],
            out_specs=pl.BlockSpec((None, tq, d_out), lambda b, qi: (b, qi, 0)),
            scratch_shapes=[pltpu.VMEM((tq, d_out), jnp.float32)],
        ),
        compiler_params=pltpu.CompilerParams(
            dimension_semantics=("parallel", "parallel"),
            vmem_limit_bytes=32 * 1024 * 1024),
    )(ctx, wo_r, bo_r)
    return out


# ------------------------------- reference --------------------------------- #
def reference_mha(x, w_query, w_key, w_value, w_out, b_out, num_heads):
    """Pure-JAX (f32) reference mirroring the PyTorch forward (eval mode)."""
    B, T, d_in = x.shape
    d_out = w_query.shape[1]
    hd = d_out // num_heads
    q = (x @ w_query).reshape(B, T, num_heads, hd).transpose(0, 2, 1, 3)
    k = (x @ w_key).reshape(B, T, num_heads, hd).transpose(0, 2, 1, 3)
    v = (x @ w_value).reshape(B, T, num_heads, hd).transpose(0, 2, 1, 3)
    scores = jnp.einsum('bhqd,bhkd->bhqk', q, k) / math.sqrt(hd)
    mask = jnp.triu(jnp.ones((T, T), dtype=bool), k=1)
    scores = jnp.where(mask[None, None], -jnp.inf, scores)
    attn = jax.nn.softmax(scores, axis=-1)
    ctx = jnp.einsum('bhqk,bhkd->bhqd', attn, v).transpose(0, 2, 1, 3)
    return ctx.reshape(B, T, d_out) @ w_out + b_out


if __name__ == "__main__":
    # Deterministic config consistent with the module (x: [B, T, 768]).
    # T=512 with 256-wide q/kv tiles exercises causal tile skipping (with the
    # clamped K/V DMA), diagonal masking and interior unmasked tiles.
    B, T = 2, 512
    d_in = d_out = 768
    num_heads = 12            # head_dim = 64 (GPT-2-small geometry)
    dropout = 0.0             # eval / inference: dropout is identity

    key = jax.random.PRNGKey(0)
    kx, kq, kk, kv, ko, kb = jax.random.split(key, 6)

    x = jax.random.uniform(kx, (B, T, d_in), dtype=jnp.float32)
    s_in = 1.0 / math.sqrt(d_in)
    w_query = jax.random.uniform(kq, (d_in, d_out), jnp.float32, -s_in, s_in)
    w_key = jax.random.uniform(kk, (d_in, d_out), jnp.float32, -s_in, s_in)
    w_value = jax.random.uniform(kv, (d_in, d_out), jnp.float32, -s_in, s_in)
    s_out = 1.0 / math.sqrt(d_out)
    w_out = jax.random.uniform(ko, (d_out, d_out), jnp.float32, -s_out, s_out)
    b_out = jax.random.uniform(kb, (d_out,), jnp.float32, -s_out, s_out)

    out = multi_head_attention(x, w_query, w_key, w_value, w_out, b_out,
                               num_heads, dropout=dropout)
    out = jax.block_until_ready(out)

    ref = reference_mha(x, w_query, w_key, w_value, w_out, b_out, num_heads)
    assert out.shape == (B, T, d_out)
    max_err = float(jnp.max(jnp.abs(out - ref)))
    # bf16 MXU operands, bf16 exp (on v6e/v7x) and approx reciprocal with f32
    # accumulation -> relaxed tolerance vs the f32 reference.
    assert jnp.allclose(out, ref, atol=4e-2, rtol=4e-2), (
        f"mismatch vs reference (max abs err {max_err})")

    print("KERNEL_OK")
</pallas_src>

<mosaic_0001>
module attributes {stable_mosaic.version = 11 : i64} {
  func.func @_qkv_proj_kernel(%arg0: i32, %arg1: i32, %arg2: i32, %arg3: memref<1x256x768xbf16, #tpu.memory_space<vmem>>, %arg4: memref<12x768x192xbf16, #tpu.memory_space<vmem>>, %arg5: memref<1x1x256x64xbf16, #tpu.memory_space<vmem>>, %arg6: memref<1x1x256x64xbf16, #tpu.memory_space<vmem>>, %arg7: memref<1x1x256x64xbf16, #tpu.memory_space<vmem>>) attributes {dimension_semantics = [#tpu.dimension_semantics<parallel>, #tpu.dimension_semantics<parallel>, #tpu.dimension_semantics<arbitrary>], iteration_bounds = array<i64: 2, 2, 12>, scalar_prefetch = 0 : i64, scratch_operands = 0 : i64, tpu.core_type = #tpu.core_type<tc>, window_params = [{transform_indices = @transform_0, window_bounds = array<i64: 1, 256, 768>}, {pipeline_mode = #tpu.pipeline_mode<synchronous>, transform_indices = @transform_1, window_bounds = array<i64: 12, 768, 192>}, {transform_indices = @transform_2, window_bounds = array<i64: 1, 1, 256, 64>}, {transform_indices = @transform_3, window_bounds = array<i64: 1, 1, 256, 64>}, {transform_indices = @transform_4, window_bounds = array<i64: 1, 1, 256, 64>}]} {
    %c0 = arith.constant 0 : index
    %c0_0 = arith.constant 0 : index
    %c0_1 = arith.constant 0 : index
    %0 = vector.load %arg3[%c0, %c0_0, %c0_1] : memref<1x256x768xbf16, #tpu.memory_space<vmem>>, vector<1x256x768xbf16>
    %1 = vector.shape_cast %0 : vector<1x256x768xbf16> to vector<256x768xbf16>
    %2 = arith.index_cast %arg2 : i32 to index
    %c0_2 = arith.constant 0 : index
    %c0_3 = arith.constant 0 : index
    %3 = vector.load %arg4[%2, %c0_2, %c0_3] : memref<12x768x192xbf16, #tpu.memory_space<vmem>>, vector<1x768x192xbf16>
    %4 = vector.shape_cast %3 : vector<1x768x192xbf16> to vector<768x192xbf16>
    %cst = arith.constant dense<0.000000e+00> : vector<256x192xf32>
    %5 = tpu.matmul %1, %4, %cst {dimension_numbers = #tpu.dot_dimension_numbers<[1], [0], [0], [1], [0, 0, 1, 1], [], []>} : vector<256x768xbf16>, vector<768x192xbf16>, vector<256x192xf32> -> vector<256x192xf32>
    %6 = vector.extract_strided_slice %5 {offsets = [0, 0], sizes = [256, 64], strides = [1, 1]} : vector<256x192xf32> to vector<256x64xf32>
    %7 = arith.truncf %6 : vector<256x64xf32> to vector<256x64xbf16>
    %c0_4 = arith.constant 0 : index
    %c0_5 = arith.constant 0 : index
    %c0_6 = arith.constant 0 : index
    %c0_7 = arith.constant 0 : index
    %8 = vector.load %arg5[%c0_4, %c0_5, %c0_6, %c0_7] : memref<1x1x256x64xbf16, #tpu.memory_space<vmem>>, vector<1x1x256x64xbf16>
    %9 = vector.shape_cast %8 : vector<1x1x256x64xbf16> to vector<256x64xbf16>
    %10 = vector.shape_cast %7 : vector<256x64xbf16> to vector<1x1x256x64xbf16>
    tpu.vector_store %arg5[%c0_4, %c0_5, %c0_6, %c0_7], %10 {strides = array<i32>} : memref<1x1x256x64xbf16, #tpu.memory_space<vmem>>, vector<1x1x256x64xbf16>,
    %11 = vector.extract_strided_slice %5 {offsets = [0, 64], sizes = [256, 64], strides = [1, 1]} : vector<256x192xf32> to vector<256x64xf32>
    %12 = arith.truncf %11 : vector<256x64xf32> to vector<256x64xbf16>
    %c0_8 = arith.constant 0 : index
    %c0_9 = arith.constant 0 : index
    %c0_10 = arith.constant 0 : index
    %c0_11 = arith.constant 0 : index
    %13 = vector.load %arg6[%c0_8, %c0_9, %c0_10, %c0_11] : memref<1x1x256x64xbf16, #tpu.memory_space<vmem>>, vector<1x1x256x64xbf16>
    %14 = vector.shape_cast %13 : vector<1x1x256x64xbf16> to vector<256x64xbf16>
    %15 = vector.shape_cast %12 : vector<256x64xbf16> to vector<1x1x256x64xbf16>
    tpu.vector_store %arg6[%c0_8, %c0_9, %c0_10, %c0_11], %15 {strides = array<i32>} : memref<1x1x256x64xbf16, #tpu.memory_space<vmem>>, vector<1x1x256x64xbf16>,
    %16 = vector.extract_strided_slice %5 {offsets = [0, 128], sizes = [256, 64], strides = [1, 1]} : vector<256x192xf32> to vector<256x64xf32>
    %17 = arith.truncf %16 : vector<256x64xf32> to vector<256x64xbf16>
    %c0_12 = arith.constant 0 : index
    %c0_13 = arith.constant 0 : index
    %c0_14 = arith.constant 0 : index
    %c0_15 = arith.constant 0 : index
    %18 = vector.load %arg7[%c0_12, %c0_13, %c0_14, %c0_15] : memref<1x1x256x64xbf16, #tpu.memory_space<vmem>>, vector<1x1x256x64xbf16>
    %19 = vector.shape_cast %18 : vector<1x1x256x64xbf16> to vector<256x64xbf16>
    %20 = vector.shape_cast %17 : vector<256x64xbf16> to vector<1x1x256x64xbf16>
    tpu.vector_store %arg7[%c0_12, %c0_13, %c0_14, %c0_15], %20 {strides = array<i32>} : memref<1x1x256x64xbf16, #tpu.memory_space<vmem>>, vector<1x1x256x64xbf16>,
    return
  }
  func.func @transform_0(%arg0: i32, %arg1: i32, %arg2: i32) -> (i32, i32, i32) {
    %c0_i32 = arith.constant 0 : i32
    %c0_i32_0 = arith.constant 0 : i32
    return %arg0, %arg1, %c0_i32 : i32, i32, i32
  }
  func.func @transform_1(%arg0: i32, %arg1: i32, %arg2: i32) -> (i32, i32, i32) {
    %c0_i32 = arith.constant 0 : i32
    %c0_i32_0 = arith.constant 0 : i32
    %c0_i32_1 = arith.constant 0 : i32
    %c0_i32_2 = arith.constant 0 : i32
    return %c0_i32, %c0_i32_0, %c0_i32_1 : i32, i32, i32
  }
  func.func @transform_2(%arg0: i32, %arg1: i32, %arg2: i32) -> (i32, i32, i32, i32) {
    %c0_i32 = arith.constant 0 : i32
    %c0_i32_0 = arith.constant 0 : i32
    return %arg0, %arg2, %arg1, %c0_i32 : i32, i32, i32, i32
  }
  func.func @transform_3(%arg0: i32, %arg1: i32, %arg2: i32) -> (i32, i32, i32, i32) {
    %c0_i32 = arith.constant 0 : i32
    %c0_i32_0 = arith.constant 0 : i32
    return %arg0, %arg2, %arg1, %c0_i32 : i32, i32, i32, i32
  }
  func.func @transform_4(%arg0: i32, %arg1: i32, %arg2: i32) -> (i32, i32, i32, i32) {
    %c0_i32 = arith.constant 0 : i32
    %c0_i32_0 = arith.constant 0 : i32
    return %arg0, %arg2, %arg1, %c0_i32 : i32, i32, i32, i32
  }
}

</mosaic_0001>

<bundles_post_ra>
// kernel: tpu_custom_call.1
= control target key start
LH: loop header
LB: loop body
LE: loop exit
PB: predicated region body
PF: predicated region fallthrough
CT: control target
= control target key end

     0   :  { %s3686_s15 = smov 0   ;;  %s3688_s16 = smov 0   ;;  %s4418_s0 = inlined_call_operand.vmem [shape: bf16[2,512,768], index: 0, kind: input, shape index: {}]   ;;  %s4419_s1 = inlined_call_operand.vmem [shape: bf16[12,768,192], index: 1, kind: input, shape index: {}]   ;;  %s4420_s2 = inlined_call_operand.vmem [shape: bf16[2,12,512,64], index: 2, kind: output, shape index: {0}]   ;;  %s4421_s3 = inlined_call_operand.vmem [shape: bf16[2,12,512,64], index: 3, kind: output, shape index: {1}]   ;;  %s4422_s4 = inlined_call_operand.vmem [shape: bf16[2,12,512,64], index: 4, kind: output, shape index: {2}]  }
   0x1   :  { %s3690_s17 = smov 0   ;;  %s3692_s18 = smov 0  }
   0x2   :  { %s3694_s19 = smov 0   ;;  %s3696_s20 = smov 0  }
   0x3   :  { %s3698_s21 = smov 0  }
   0x4 LB: > { %s27_s22 = sadd.s32 1, %s3646_s18  ;;  %s30_s23 = sadd.s32 1, %s3650_s19  ;;  %s3658_s21 = sphi %s3698_s21, %s15_s21   ;;  %s3654_s20 = sphi %s3696_s20, %s4428_s20   ;;  %s3650_s19 = sphi %s3694_s19, %s4427_s19   ;;  %s3646_s18 = sphi %s3692_s18, %s4426_s18   ;;  %s3642_s17 = sphi %s3690_s17, %s4425_s17   ;;  %s3638_s16 = sphi %s3688_s16, %s4424_s16   ;;  %s3634_s15 = sphi %s3686_s15, %s4423_s15  }
   0x5   : > { %p28_p0 = scmp.ge.s32.totalorder %s27_s22, 12  ;;  %p2760_p1 = scmp.ge.s32.totalorder %s3658_s21, 1 }
   0x6   : > { %p206_p2 = scmp.lt.s32.totalorder %s3658_s21, 49  ;;  %s34_s24 = sadd.s32 1, %s3654_s20 }
   0x7   : > { %s4430_s22 = smov (%p28_p0, %s27_s22), 0  ;;  %s4432_s23 = smov (!%p28_p0, %s30_s23), %s3650_s19 }
   0x8   : > { %p207_p3 = pnand %p2760_p1, %p206_p2  ;;  %p32_p4 = scmp.ge.s32.totalorder %s4432_s23, 2 }
   0x9   : > { %s3031_s25 = smul.u32 (!%p207_p3), 768, %s3634_s15  ;;  %s2761_s29 = sshll.u32 (!%p207_p3), %s3638_s16, 5  ;;  %vm2186_vm0 = vcmask (!%p207_p3), 519168  }
   0xa   : > { %s4434_s23 = smov (%p32_p4, %s4432_s23), 0  ;;  %s4436_s24 = smov (!%p32_p4, %s34_s24), %s3654_s20 }
   0xb   : > { %p36_p5 = scmp.ge.s32.totalorder %s4436_s24, 2  ;;  %210 = sbr.rel (%p207_p3) target bundleno = 597 (0x255), region = 28 }
   0xc   : > { %s3738_s28 = scalar_lea.vmem (!%p207_p3), %s4419_s1, %s3031_s25  ;;  %p272_p6 = scmp.lt.s32.totalorder (!%p207_p3), %s3642_s17, 1 }
   0xd   : > { %s4438_s24 = smov (%p36_p5, %s4436_s24), 0  ;;  %v3316_v0 = vld [vmem:[%s3738_s28 + $0x4] ss:$8 sps:$4 sm:$0xff] (!%p207_p3)   ;;  %v3320_v2 = vld [vmem:[%s3738_s28] ss:$8 sps:$4 sm:$0xff] (!%p207_p3)   ;;  %p274_p7 = scmp.lt.s32.totalorder (!%p207_p3), %s2761_s29, 63 }
   0xe   : > { %v3742_v1 = vld [vmem:[%s3738_s28 + $0x104] ss:$8 sps:$4 sm:$0xff] (!%p207_p3)   ;;  %1479 = vmatprep.subr.bf16.mxu1 (!%p207_p3), %v3316_v0  ;;  %v3746_v3 = vld [vmem:[%s3738_s28 + $0x100] ss:$8 sps:$4 sm:$0xff] (!%p207_p3)   ;;  %v3322_v4 = vld [vmem:[%s3738_s28 + $0x14] ss:$8 sps:$4 sm:$0xff] (!%p207_p3)  }
   0xf   : > { %1672 = vmatprep.subr.bf16.mxu0 (!%p207_p3), %v3742_v1  ;;  %1480 = vmatpush1.bf16.msra.mxu1 (!%p207_p3), %v3320_v2  ;;  %v3752_v5 = vld [vmem:[%s3738_s28 + $0x114] ss:$8 sps:$4 sm:$0xff] (!%p207_p3)   ;;  %v3326_v6 = vld [vmem:[%s3738_s28 + $0x10] ss:$8 sps:$4 sm:$0xff] (!%p207_p3)   ;;  %v3328_v8 = vld [vmem:[%s3738_s28 + $0x24] ss:$8 sps:$4 sm:$0xff] (!%p207_p3)  }
  0x10   : > { %1673 = vmatpush1.bf16.msra.mxu0 (!%p207_p3), %v3746_v3  ;;  %1481 = vmatprep.subr.bf16.mxu1 (!%p207_p3), %v3322_v4  ;;  %v3756_v7 = vld [vmem:[%s3738_s28 + $0x110] ss:$8 sps:$4 sm:$0xff] (!%p207_p3)   ;;  %v3761_v9 = vld [vmem:[%s3738_s28 + $0x124] ss:$8 sps:$4 sm:$0xff] (!%p207_p3)   ;;  %v3332_v10 = vld [vmem:[%s3738_s28 + $0x20] ss:$8 sps:$4 sm:$0xff] (!%p207_p3)  }
  0x11   : > { %1674 = vmatprep.subr.bf16.mxu0 (!%p207_p3), %v3752_v5  ;;  %v3765_v11 = vld [vmem:[%s3738_s28 + $0x120] ss:$8 sps:$4 sm:$0xff] (!%p207_p3)   ;;  %v3334_v12 = vld [vmem:[%s3738_s28 + $0x34] ss:$8 sps:$4 sm:$0xff] (!%p207_p3)   ;;  %v3338_v14 = vld [vmem:[%s3738_s28 + $0x30] ss:$8 sps:$4 sm:$0xff] (!%p207_p3)  }
  0x12   : > { %v3771_v13 = vld [vmem:[%s3738_s28 + $0x134] ss:$8 sps:$4 sm:$0xff]   ;;  %v3776_v15 = vld [vmem:[%s3738_s28 + $0x130] ss:$8 sps:$4 sm:$0xff]   ;;  %v3340_v16 = vld [vmem:[%s3738_s28 + $0x44] ss:$8 sps:$4 sm:$0xff]  }
  0x13   : > { %1482 = vmatpush1.bf16.msra.mxu1 %v3326_v6  ;;  %v3781_v17 = vld [vmem:[%s3738_s28 + $0x144] ss:$8 sps:$4 sm:$0xff]   ;;  %v3344_v18 = vld [vmem:[%s3738_s28 + $0x40] ss:$8 sps:$4 sm:$0xff]   ;;  %v3346_v20 = vld [vmem:[%s3738_s28 + $0x54] ss:$8 sps:$4 sm:$0xff]  }
  0x14   : > { %1675 = vmatpush1.bf16.msra.mxu0 %v3756_v7  ;;  %1483 = vmatprep.subr.bf16.mxu1 %v3328_v8  ;;  %v3785_v19 = vld [vmem:[%s3738_s28 + $0x140] ss:$8 sps:$4 sm:$0xff]   ;;  %v3791_v21 = vld [vmem:[%s3738_s28 + $0x154] ss:$8 sps:$4 sm:$0xff]   ;;  %v3350_v22 = vld [vmem:[%s3738_s28 + $0x50] ss:$8 sps:$4 sm:$0xff]  }
  0x15   : > { %1676 = vmatprep.subr.bf16.mxu0 %v3761_v9  ;;  %v3797_v23 = vld [vmem:[%s3738_s28 + $0x150] ss:$8 sps:$4 sm:$0xff]   ;;  %v3352_v24 = vld [vmem:[%s3738_s28 + $0x64] ss:$8 sps:$4 sm:$0xff]   ;;  %v3356_v26 = vld [vmem:[%s3738_s28 + $0x60] ss:$8 sps:$4 sm:$0xff]  }
  0x16   : > { %v3802_v25 = vld [vmem:[%s3738_s28 + $0x164] ss:$8 sps:$4 sm:$0xff]   ;;  %v3807_v27 = vld [vmem:[%s3738_s28 + $0x160] ss:$8 sps:$4 sm:$0xff]   ;;  %v3358_v28 = vld [vmem:[%s3738_s28 + $0x74] ss:$8 sps:$4 sm:$0xff]  }
  0x17   : > { %1484 = vmatpush1.bf16.msra.mxu1 %v3332_v10  ;;  %v3813_v29 = vld [vmem:[%s3738_s28 + $0x174] ss:$8 sps:$4 sm:$0xff]   ;;  %s4440_s17 = smov (!%p272_p6, %s3642_s17), 1  ;;  %s4442_s29 = smov (!%p274_p7, %s2761_s29), 63  ;;  %v3362_v30 = vld [vmem:[%s3738_s28 + $0x70] ss:$8 sps:$4 sm:$0xff]  }
  0x18   : > { %1677 = vmatpush1.bf16.msra.mxu0 %v3765_v11  ;;  %1485 = vmatprep.subr.bf16.mxu1 %v3334_v12  ;;  %v3823_v31 = vld [vmem:[%s3738_s28 + $0x170] ss:$8 sps:$4 sm:$0xff]   ;;  %v3364_v32 = vld [vmem:[%s3738_s28 + $0x84] ss:$8 sps:$4 sm:$0xff]   ;;  %s3257_s30 = smul.u32 384, %s4440_s17  ;;  %p285_p8 = scmp.lt.s32.totalorder %s3634_s15, 11 }
  0x19   : > { %1678 = vmatprep.subr.bf16.mxu0 %v3771_v13  ;;  %v3828_v33 = vld [vmem:[%s3738_s28 + $0x184] ss:$8 sps:$4 sm:$0xff]   ;;  %s3256_s5 = smul.u32 6, %s4442_s29  ;;  %v3368_v34 = vld [vmem:[%s3738_s28 + $0x80] ss:$8 sps:$4 sm:$0xff]  }
  0x1a   : > { %v3834_v35 = vld [vmem:[%s3738_s28 + $0x180] ss:$8 sps:$4 sm:$0xff]   ;;  %v3370_v36 = vld [vmem:[%s3738_s28 + $0x94] ss:$8 sps:$4 sm:$0xff]   ;;  %v3374_v38 = vld [vmem:[%s3738_s28 + $0x90] ss:$8 sps:$4 sm:$0xff]  }
  0x1b   : > { %1486 = vmatpush1.bf16.msra.mxu1 %v3338_v14  ;;  %v3840_v37 = vld [vmem:[%s3738_s28 + $0x194] ss:$8 sps:$4 sm:$0xff]   ;;  %s278_s6 = sadd.s32 %s3257_s30, %s3256_s5  ;;  %v3845_v39 = vld [vmem:[%s3738_s28 + $0x190] ss:$8 sps:$4 sm:$0xff]   ;;  %v3376_v40 = vld [vmem:[%s3738_s28 + $0xa4] ss:$8 sps:$4 sm:$0xff]  }
  0x1c   : > { %1679 = vmatpush1.bf16.msra.mxu0 %v3776_v15  ;;  %1487 = vmatprep.subr.bf16.mxu1 %v3340_v16  ;;  %v3850_v41 = vld [vmem:[%s3738_s28 + $0x1a4] ss:$8 sps:$4 sm:$0xff]   ;;  %s2762_s7 = sshll.u32 %s278_s6, 2  ;;  %v3380_v42 = vld [vmem:[%s3738_s28 + $0xa0] ss:$8 sps:$4 sm:$0xff]   ;;  %s4444_s15 = smov (!%p285_p8, %s3634_s15), 11 }
  0x1d   : > { %1680 = vmatprep.subr.bf16.mxu0 %v3781_v17  ;;  %v3854_v43 = vld [vmem:[%s3738_s28 + $0x1a0] ss:$8 sps:$4 sm:$0xff]   ;;  %v3382_v44 = vld [vmem:[%s3738_s28 + $0xb4] ss:$8 sps:$4 sm:$0xff]   ;;  %s3861_s10 = scalar_lea.vmem %s4418_s0, %s2762_s7  ;;  %v3386_v46 = vld [vmem:[%s3738_s28 + $0xb0] ss:$8 sps:$4 sm:$0xff]  }
  0x1e   : > { %v3865_v45 = vld [vmem:[%s3738_s28 + $0x1b4] ss:$8 sps:$4 sm:$0xff]   ;;  %v3869_v47 = vld [vmem:[%s3738_s28 + $0x1b0] ss:$8 sps:$4 sm:$0xff]   ;;  %v3388_v48 = vld [vmem:[%s3738_s28 + $0xc4] ss:$8 sps:$4 sm:$0xff]  }
  0x1f   : > { %1488 = vmatpush1.bf16.msra.mxu1 %v3344_v18  ;;  %v3414_v49 = vld [vmem:[%s3861_s10 + $0x4] ss:$24 sps:$4 sm:$0xff]   ;;  %v3392_v52 = vld [vmem:[%s3738_s28 + $0xc0] ss:$8 sps:$4 sm:$0xff]   ;;  %v3398_v56 = vld [vmem:[%s3738_s28 + $0xd0] ss:$8 sps:$4 sm:$0xff]  }
  0x20   : > { %1681 = vmatpush1.bf16.msra.mxu0 %v3785_v19  ;;  %1489 = vmatprep.subr.bf16.mxu1 %v3346_v20  ;;  %v3875_v50 = vld [vmem:[%s3738_s28 + $0x1c4] ss:$8 sps:$4 sm:$0xff]   ;;  %v3881_v53 = vld [vmem:[%s3738_s28 + $0x1c0] ss:$8 sps:$4 sm:$0xff]   ;;  %v3394_v54 = vld [vmem:[%s3738_s28 + $0xd4] ss:$8 sps:$4 sm:$0xff]  }
  0x21   : > { %1682 = vmatprep.subr.bf16.mxu0 %v3791_v21  ;;  %v3417_v51 = vld [vmem:[%s3861_s10 + $0xc] ss:$24 sps:$4 sm:$0xff]   ;;  %1511 = vmatprep.mubr.bf16.mxu1 %v3414_v49  ;;  %v3887_v55 = vld [vmem:[%s3738_s28 + $0x1d4] ss:$8 sps:$4 sm:$0xff]   ;;  %v3891_v57 = vld [vmem:[%s3738_s28 + $0x1d0] ss:$8 sps:$4 sm:$0xff]  }
  0x22   : > { %1704 = vmatprep.mubr.bf16.mxu0 %v3417_v51  ;;  %v3400_v58 = vld [vmem:[%s3738_s28 + $0xe4] ss:$8 sps:$4 sm:$0xff]   ;;  %v3404_v60 = vld [vmem:[%s3738_s28 + $0xe0] ss:$8 sps:$4 sm:$0xff]   ;;  %v3406_v62 = vld [vmem:[%s3738_s28 + $0xf4] ss:$8 sps:$4 sm:$0xff]  }
  0x23   : > { %1490 = vmatpush1.bf16.msra.mxu1 %v3350_v22  ;;  %v3897_v59 = vld [vmem:[%s3738_s28 + $0x1e4] ss:$8 sps:$4 sm:$0xff]   ;;  %v3901_v61 = vld [vmem:[%s3738_s28 + $0x1e0] ss:$8 sps:$4 sm:$0xff]   ;;  %v3907_v63 = vld [vmem:[%s3738_s28 + $0x1f4] ss:$8 sps:$4 sm:$0xff]  }
  0x24   : > { %1683 = vmatpush1.bf16.msra.mxu0 %v3797_v23  ;;  %1491 = vmatprep.subr.bf16.mxu1 %v3352_v24  ;;  %v3410_v0 = vld [vmem:[%s3738_s28 + $0xf0] ss:$8 sps:$4 sm:$0xff]   ;;  %v3420_v4 = vld [vmem:[%s3738_s28 + $0x204] ss:$8 sps:$4 sm:$0xff]   ;;  %v3415_v8 = vld [vmem:[%s3861_s10 + $0x8] ss:$24 sps:$4 sm:$0xff]  }
  0x25   : > { %1684 = vmatprep.subr.bf16.mxu0 %v3802_v25  ;;  %v3912_v2 = vld [vmem:[%s3738_s28 + $0x1f0] ss:$8 sps:$4 sm:$0xff]   ;;  %v3418_v10 = vld [vmem:[%s3738_s28 + $0x200] ss:$8 sps:$4 sm:$0xff]   ;;  %v3423_v12 = vld [vmem:[%s3738_s28 + $0x214] ss:$8 sps:$4 sm:$0xff]  }
  0x26   : > { %v3412_v6 = vld [vmem:[%s3861_s10] ss:$24 sps:$4 sm:$0xff]   ;;  %v3424_v14 = vld [vmem:[%s3861_s10 + $0x34] ss:$24 sps:$4 sm:$0xff]   ;;  %v3428_v22 = vld [vmem:[%s3861_s10 + $0x30] ss:$24 sps:$4 sm:$0xff]  }
  0x27   : > { %1492 = vmatpush1.bf16.msra.mxu1 %v3356_v26  ;;  %v3426_v16 = vld [vmem:[%s3861_s10 + $0x3c] ss:$24 sps:$4 sm:$0xff]   ;;  %v3421_v18 = vld [vmem:[%s3738_s28 + $0x210] ss:$8 sps:$4 sm:$0xff]   ;;  %v3432_v20 = vld [vmem:[%s3738_s28 + $0x224] ss:$8 sps:$4 sm:$0xff]  }
  0x28   : > { %1685 = vmatpush1.bf16.msra.mxu0 %v3807_v27  ;;  %1493 = vmatprep.subr.bf16.mxu1 %v3358_v28  ;;  %v3430_v24 = vld [vmem:[%s3738_s28 + $0x220] ss:$8 sps:$4 sm:$0xff]   ;;  %v3435_v26 = vld [vmem:[%s3738_s28 + $0x234] ss:$8 sps:$4 sm:$0xff]   ;;  %v3438_v28 = vld [vmem:[%s3861_s10 + $0x6c] ss:$24 sps:$4 sm:$0xff]  }
  0x29   : > { %1686 = vmatprep.subr.bf16.mxu0 %v3813_v29  ;;  %v3464_v49 = vld [vmem:[%s3861_s10 + $0xc0] ss:$24 sps:$4 sm:$0xff]   ;;  %s2764_s11 = sshll.u32 %s4444_s15, 6  ;;  %s3258_s12 = smul.u32 768, %s4440_s17 }
  0x2a   : > { %v3465_v51 = vld [vmem:[%s3861_s10 + $0xc8] ss:$24 sps:$4 sm:$0xff]   ;;  %s290_s13 = sadd.s32 %s2764_s11, %s4442_s29  ;;  %s3660_s29 = smov 64  }
  0x2b   : > { %1494 = vmatpush1.bf16.msra.mxu1 %v3362_v30  ;;  %v3444_v30 = vld [vmem:[%s3738_s28 + $0x244] ss:$8 sps:$4 sm:$0xff]   ;;  %s292_s14 = sadd.s32 %s3258_s12, %s290_s13 }
  0x2c   : > { %1687 = vmatpush1.bf16.msra.mxu0 %v3823_v31  ;;  %1495 = vmatprep.subr.bf16.mxu1 %v3364_v32  ;;  %v3440_v32 = vld [vmem:[%s3861_s10 + $0x60] ss:$24 sps:$4 sm:$0xff]   ;;  %s4128_s16 = sshll.u32 %s292_s14, 2 }
  0x2d   : > { %1688 = vmatprep.subr.bf16.mxu0 %v3828_v33  ;;  %s4134_s26 = scalar_lea.vmem %s4420_s2, %s4128_s16  ;;  %s4314_s6 = scalar_lea.vmem %s4421_s3, %s4128_s16 }
  0x2f   : > { %1496 = vmatpush1.bf16.msra.mxu1 %v3368_v34  ;;  %v3442_v34 = vld [vmem:[%s3738_s28 + $0x240] ss:$8 sps:$4 sm:$0xff]  }
  0x30   : > { %1689 = vmatpush1.bf16.msra.mxu0 %v3834_v35  ;;  %1497 = vmatprep.subr.bf16.mxu1 %v3370_v36  ;;  %v3447_v36 = vld [vmem:[%s3738_s28 + $0x254] ss:$8 sps:$4 sm:$0xff]  }
  0x31   : > { %1690 = vmatprep.subr.bf16.mxu0 %v3840_v37 }
  0x33   : > { %1498 = vmatpush1.bf16.msra.mxu1 %v3374_v38  ;;  %v3450_v38 = vld [vmem:[%s3861_s10 + $0x9c] ss:$24 sps:$4 sm:$0xff]  }
  0x34   : > { %1691 = vmatpush1.bf16.msra.mxu0 %v3845_v39  ;;  %1499 = vmatprep.subr.bf16.mxu1 %v3376_v40  ;;  %v3452_v40 = vld [vmem:[%s3861_s10 + $0x90] ss:$24 sps:$4 sm:$0xff]  }
  0x35   : > { %1692 = vmatprep.subr.bf16.mxu0 %v3850_v41 }
  0x37   : > { %1500 = vmatpush1.bf16.msra.mxu1 %v3380_v42  ;;  %v3453_v42 = vld [vmem:[%s3861_s10 + $0x98] ss:$24 sps:$4 sm:$0xff]  }
  0x38   : > { %1693 = vmatpush1.bf16.msra.mxu0 %v3854_v43  ;;  %1501 = vmatprep.subr.bf16.mxu1 %v3382_v44  ;;  %v3454_v44 = vld [vmem:[%s3738_s28 + $0x260] ss:$8 sps:$4 sm:$0xff]  }
  0x39   : > { %1694 = vmatprep.subr.bf16.mxu0 %v3865_v45 }
  0x3b   : > { %1502 = vmatpush1.bf16.msra.mxu1 %v3386_v46  ;;  %v3459_v46 = vld [vmem:[%s3738_s28 + $0x274] ss:$8 sps:$4 sm:$0xff]  }
  0x3c   : > { %1695 = vmatpush1.bf16.msra.mxu0 %v3869_v47  ;;  %1503 = vmatprep.subr.bf16.mxu1 %v3388_v48  ;;  %v3462_v48 = vld [vmem:[%s3861_s10 + $0xcc] ss:$24 sps:$4 sm:$0xff]  }
  0x3d   : > { %1696 = vmatprep.subr.bf16.mxu0 %v3875_v50 }
  0x3f   : > { %1504 = vmatpush1.bf16.msra.mxu1 %v3392_v52  ;;  %v3466_v52 = vld [vmem:[%s3738_s28 + $0x280] ss:$8 sps:$4 sm:$0xff]  }
  0x40   : > { %1697 = vmatpush1.bf16.msra.mxu0 %v3881_v53  ;;  %1505 = vmatprep.subr.bf16.mxu1 %v3394_v54  ;;  %v3472_v54 = vld [vmem:[%s3861_s10 + $0xf4] ss:$24 sps:$4 sm:$0xff]  }
  0x41   : > { %1698 = vmatprep.subr.bf16.mxu0 %v3887_v55 }
  0x43   : > { %1506 = vmatpush1.bf16.msra.mxu1 %v3398_v56  ;;  %v3474_v56 = vld [vmem:[%s3861_s10 + $0xfc] ss:$24 sps:$4 sm:$0xff]  }
  0x44   : > { %1699 = vmatpush1.bf16.msra.mxu0 %v3891_v57  ;;  %1507 = vmatprep.subr.bf16.mxu1 %v3400_v58  ;;  %v3476_v58 = vld [vmem:[%s3861_s10 + $0xf0] ss:$24 sps:$4 sm:$0xff]  }
  0x45   : > { %1700 = vmatprep.subr.bf16.mxu0 %v3897_v59 }
  0x47   : > { %1508 = vmatpush1.bf16.msra.mxu1 %v3404_v60  ;;  %v3477_v60 = vld [vmem:[%s3861_s10 + $0xf8] ss:$24 sps:$4 sm:$0xff]  }
  0x48   : > { %1701 = vmatpush1.bf16.msra.mxu0 %v3901_v61  ;;  %1509 = vmatprep.subr.bf16.mxu1 %v3406_v62  ;;  %v3478_v62 = vld [vmem:[%s3738_s28 + $0x2a0] ss:$8 sps:$4 sm:$0xff]  }
  0x49   : > { %1702 = vmatprep.subr.bf16.mxu0 %v3907_v63 }
  0x4b   : > { %1510 = vmatpush1.bf16.msra.mxu1 %v3410_v0  ;;  %v3483_v0 = vld [vmem:[%s3738_s28 + $0x2b4] ss:$8 sps:$4 sm:$0xff]  }
  0x4c   : > { %1703 = vmatpush1.bf16.msra.mxu0 %v3912_v2  ;;  %3096 = vmatprep.subr.bf16.mxu1 %v3742_v1  ;;  %v3429_v1 = vld [vmem:[%s3861_s10 + $0x38] ss:$24 sps:$4 sm:$0xff]  }
  0x4d   : > { %1865 = vmatprep.subr.bf16.mxu0 %v3420_v4  ;;  %v3486_v4 = vld [vmem:[%s3861_s10 + $0x12c] ss:$24 sps:$4 sm:$0xff]  }
  0x4e   : > { %1512 = vmatmul.mubr.bf16.vlgmr.msra.gmra.mrb[0].mxu1 %v3412_v6  ;;  %v3488_v6 = vld [vmem:[%s3861_s10 + $0x120] ss:$24 sps:$4 sm:$0xff]  }
  0x4f   : > { %1705 = vmatmul.mubr.bf16.vlgmr.msra.gmra.mrb[0].mxu0 %v3415_v8  ;;  %3112 = vmatpush1.bf16.msra.mxu1 %v3746_v3  ;;  %v3436_v3 = vld [vmem:[%s3861_s10 + $0x64] ss:$24 sps:$4 sm:$0xff]   ;;  %v3489_v8 = vld [vmem:[%s3861_s10 + $0x128] ss:$24 sps:$4 sm:$0xff]  }
  0x50   : > { %1866 = vmatpush1.bf16.msra.mxu0 %v3418_v10  ;;  %1521 = vmatprep.mubr.bf16.mxu1 %v3424_v14  ;;  %v3490_v10 = vld [vmem:[%s3738_s28 + $0x2c0] ss:$8 sps:$4 sm:$0xff]   ;;  %v3498_v14 = vld [vmem:[%s3861_s10 + $0x15c] ss:$24 sps:$4 sm:$0xff]  }
  0x51   : > { %1867 = vmatprep.subr.bf16.mxu0 %v3423_v12  ;;  %1714 = vmatprep.mubr.bf16.mxu0 %v3426_v16  ;;  %v3496_v12 = vld [vmem:[%s3861_s10 + $0x154] ss:$24 sps:$4 sm:$0xff]   ;;  %v3500_v16 = vld [vmem:[%s3861_s10 + $0x150] ss:$24 sps:$4 sm:$0xff]  }
  0x52   : > { %3097 = vmatprep.subr.bf16.mxu1 %v3752_v5  ;;  %v3433_v5 = vld [vmem:[%s3738_s28 + $0x230] ss:$8 sps:$4 sm:$0xff]  }
  0x53   : > { %3113 = vmatpush1.bf16.msra.mxu1 %v3756_v7  ;;  %v3441_v7 = vld [vmem:[%s3861_s10 + $0x68] ss:$24 sps:$4 sm:$0xff]  }
  0x54   : > { %1868 = vmatpush1.bf16.msra.mxu0 %v3421_v18  ;;  %3098 = vmatprep.subr.bf16.mxu1 %v3761_v9  ;;  %v3448_v9 = vld [vmem:[%s3861_s10 + $0x94] ss:$24 sps:$4 sm:$0xff]   ;;  %v3501_v18 = vld [vmem:[%s3861_s10 + $0x158] ss:$24 sps:$4 sm:$0xff]  }
  0x55   : > { %1869 = vmatprep.subr.bf16.mxu0 %v3432_v20  ;;  %v3502_v20 = vld [vmem:[%s3738_s28 + $0x2e0] ss:$8 sps:$4 sm:$0xff]  }
  0x56   : > { %1522 = vmatmul.mubr.bf16.gmra.mrb[4].mxu1 %v3428_v22  ;;  %v3507_v22 = vld [vmem:[%s3738_s28 + $0x2f4] ss:$8 sps:$4 sm:$0xff]  }
  0x57   : > { %1715 = vmatmul.mubr.bf16.gmra.mrb[4].mxu0 %v3429_v1  ;;  %1531 = vmatprep.mubr.bf16.mxu1 %v3436_v3  ;;  %v3512_v1 = vld [vmem:[%s3861_s10 + $0x14] ss:$24 sps:$4 sm:$0xff]   ;;  %v3519_v3 = vld [vmem:[%s3861_s10 + $0x40] ss:$24 sps:$4 sm:$0xff]  }
  0x58   : > { %1870 = vmatpush1.bf16.msra.mxu0 %v3430_v24  ;;  %1724 = vmatprep.mubr.bf16.mxu0 %v3438_v28  ;;  %v3505_v24 = vld [vmem:[%s3738_s28 + $0x2f0] ss:$8 sps:$4 sm:$0xff]   ;;  %v3522_v28 = vld [vmem:[%s3861_s10 + $0x74] ss:$24 sps:$4 sm:$0xff]  }
  0x59   : > { %1871 = vmatprep.subr.bf16.mxu0 %v3435_v26  ;;  %3114 = vmatpush1.bf16.msra.mxu1 %v3765_v11  ;;  %v3445_v11 = vld [vmem:[%s3738_s28 + $0x250] ss:$8 sps:$4 sm:$0xff]   ;;  %v3516_v26 = vld [vmem:[%s3861_s10 + $0x44] ss:$24 sps:$4 sm:$0xff]  }
  0x5a   : > { %3099 = vmatprep.subr.bf16.mxu1 %v3771_v13  ;;  %v3456_v13 = vld [vmem:[%s3738_s28 + $0x264] ss:$8 sps:$4 sm:$0xff]  }
  0x5c   : > { %1872 = vmatpush1.bf16.msra.mxu0 %v3433_v5  ;;  %v3531_v5 = vld [vmem:[%s3861_s10 + $0xa0] ss:$24 sps:$4 sm:$0xff]  }
  0x5d   : > { %1873 = vmatprep.subr.bf16.mxu0 %v3444_v30  ;;  %3115 = vmatpush1.bf16.msra.mxu1 %v3776_v15  ;;  %v3460_v15 = vld [vmem:[%s3861_s10 + $0xc4] ss:$24 sps:$4 sm:$0xff]  }
  0x5e   : > { %1532 = vmatmul.mubr.bf16.gmra.mrb[8].mxu1 %v3440_v32  ;;  %3100 = vmatprep.subr.bf16.mxu1 %v3781_v17  ;;  %v3457_v17 = vld [vmem:[%s3738_s28 + $0x270] ss:$8 sps:$4 sm:$0xff]   ;;  %v3532_v30 = vld [vmem:[%s3861_s10 + $0x244] ss:$24 sps:$4 sm:$0xff]  }
  0x5f   : > { %1725 = vmatmul.mubr.bf16.gmra.mrb[8].mxu0 %v3441_v7  ;;  %1541 = vmatprep.mubr.bf16.mxu1 %v3448_v9  ;;  %v3537_v32 = vld [vmem:[%s3861_s10 + $0xd0] ss:$24 sps:$4 sm:$0xff]   ;;  %v3538_v7 = vld [vmem:[%s3861_s10 + $0x274] ss:$24 sps:$4 sm:$0xff]   ;;  %v3543_v9 = vld [vmem:[%s3861_s10 + $0x100] ss:$24 sps:$4 sm:$0xff]  }
  0x60   : > { %1874 = vmatpush1.bf16.msra.mxu0 %v3442_v34  ;;  %1734 = vmatprep.mubr.bf16.mxu0 %v3450_v38  ;;  %v3540_v34 = vld [vmem:[%s3861_s10 + $0x104] ss:$24 sps:$4 sm:$0xff]  }
  0x61   : > { %1875 = vmatprep.subr.bf16.mxu0 %v3447_v36  ;;  %3116 = vmatpush1.bf16.msra.mxu1 %v3785_v19  ;;  %v3468_v19 = vld [vmem:[%s3738_s28 + $0x284] ss:$8 sps:$4 sm:$0xff]   ;;  %v3542_v36 = vld [vmem:[%s3861_s10 + $0x270] ss:$24 sps:$4 sm:$0xff]  }
  0x62   : > { %3101 = vmatprep.subr.bf16.mxu1 %v3791_v21  ;;  %v3471_v21 = vld [vmem:[%s3738_s28 + $0x294] ss:$8 sps:$4 sm:$0xff]  }
  0x63   : > { %v3544_v38 = vld [vmem:[%s3861_s10 + $0x2a4] ss:$24 sps:$4 sm:$0xff]  }
  0x64   : > { %1876 = vmatpush1.bf16.msra.mxu0 %v3445_v11  ;;  %v3546_v11 = vld [vmem:[%s3861_s10 + $0x134] ss:$24 sps:$4 sm:$0xff]  }
  0x65   : > { %1877 = vmatprep.subr.bf16.mxu0 %v3456_v13  ;;  %3117 = vmatpush1.bf16.msra.mxu1 %v3797_v23  ;;  %v3469_v23 = vld [vmem:[%s3738_s28 + $0x290] ss:$8 sps:$4 sm:$0xff]  }
  0x66   : > { %1542 = vmatmul.mubr.bf16.gmra.mrb[12].mxu1 %v3452_v40  ;;  %3102 = vmatprep.subr.bf16.mxu1 %v3802_v25  ;;  %v3480_v25 = vld [vmem:[%s3738_s28 + $0x2a4] ss:$8 sps:$4 sm:$0xff]   ;;  %v3548_v13 = vld [vmem:[%s3861_s10 + $0x2a0] ss:$24 sps:$4 sm:$0xff]   ;;  %v3549_v40 = vld [vmem:[%s3861_s10 + $0x130] ss:$24 sps:$4 sm:$0xff]  }
  0x67   : > { %1735 = vmatmul.mubr.bf16.gmra.mrb[12].mxu0 %v3453_v42  ;;  %1551 = vmatprep.mubr.bf16.mxu1 %v3460_v15  ;;  %v3550_v42 = vld [vmem:[%s3861_s10 + $0x2d4] ss:$24 sps:$4 sm:$0xff]   ;;  %v3555_v15 = vld [vmem:[%s3861_s10 + $0x160] ss:$24 sps:$4 sm:$0xff]  }
  0x68   : > { %1878 = vmatpush1.bf16.msra.mxu0 %v3454_v44  ;;  %1744 = vmatprep.mubr.bf16.mxu0 %v3462_v48  ;;  %v3552_v44 = vld [vmem:[%s3861_s10 + $0x164] ss:$24 sps:$4 sm:$0xff]  }
  0x69   : > { %1879 = vmatprep.subr.bf16.mxu0 %v3459_v46  ;;  %3118 = vmatpush1.bf16.msra.mxu1 %v3807_v27  ;;  %v3484_v27 = vld [vmem:[%s3861_s10 + $0x124] ss:$24 sps:$4 sm:$0xff]   ;;  %v3554_v46 = vld [vmem:[%s3861_s10 + $0x2d0] ss:$24 sps:$4 sm:$0xff]  }
  0x6a   : > { %3103 = vmatprep.subr.bf16.mxu1 %v3813_v29  ;;  %v3481_v29 = vld [vmem:[%s3738_s28 + $0x2b0] ss:$8 sps:$4 sm:$0xff]   ;;  %v3558_v48 = vld [vmem:[%s3861_s10 + $0x18c] ss:$24 sps:$4 sm:$0xff]  }
  0x6c   : > { %1880 = vmatpush1.bf16.msra.mxu0 %v3457_v17  ;;  %v3559_v17 = vld [vmem:[%s3861_s10 + $0x194] ss:$24 sps:$4 sm:$0xff]  }
  0x6d   : > { %1881 = vmatprep.subr.bf16.mxu0 %v3468_v19  ;;  %3119 = vmatpush1.bf16.msra.mxu1 %v3823_v31  ;;  %v3492_v31 = vld [vmem:[%s3738_s28 + $0x2c4] ss:$8 sps:$4 sm:$0xff]   ;;  %v3556_v19 = vld [vmem:[%s3861_s10 + $0x188] ss:$24 sps:$4 sm:$0xff]  }
  0x6e   : > { %1552 = vmatmul.mubr.bf16.gmra.mrb[16].mxu1 %v3464_v49  ;;  %3104 = vmatprep.subr.bf16.mxu1 %v3828_v33  ;;  %v3495_v33 = vld [vmem:[%s3738_s28 + $0x2d4] ss:$8 sps:$4 sm:$0xff]   ;;  %v3561_v49 = vld [vmem:[%s3861_s10 + $0x190] ss:$24 sps:$4 sm:$0xff]  }
  0x6f   : > { %1745 = vmatmul.mubr.bf16.gmra.mrb[16].mxu0 %v3465_v51  ;;  %1561 = vmatprep.mubr.bf16.mxu1 %v3472_v54  ;;  %v3562_v51 = vld [vmem:[%s3861_s10 + $0x1bc] ss:$24 sps:$4 sm:$0xff]   ;;  %v3567_v54 = vld [vmem:[%s3861_s10 + $0x1c0] ss:$24 sps:$4 sm:$0xff]  }
  0x70   : > { %1882 = vmatpush1.bf16.msra.mxu0 %v3466_v52  ;;  %1754 = vmatprep.mubr.bf16.mxu0 %v3474_v56  ;;  %v3564_v52 = vld [vmem:[%s3861_s10 + $0x1c4] ss:$24 sps:$4 sm:$0xff]  }
  0x71   : > { %1883 = vmatprep.subr.bf16.mxu0 %v3471_v21  ;;  %3120 = vmatpush1.bf16.msra.mxu1 %v3834_v35  ;;  %v3493_v35 = vld [vmem:[%s3738_s28 + $0x2d0] ss:$8 sps:$4 sm:$0xff]   ;;  %v3568_v56 = vld [vmem:[%s3861_s10 + $0x1ec] ss:$24 sps:$4 sm:$0xff]  }
  0x72   : > { %3105 = vmatprep.subr.bf16.mxu1 %v3840_v37  ;;  %v3504_v37 = vld [vmem:[%s3738_s28 + $0x2e4] ss:$8 sps:$4 sm:$0xff]   ;;  %v3566_v21 = vld [vmem:[%s3861_s10 + $0x1b8] ss:$24 sps:$4 sm:$0xff]   ;;  %s4140_s28 = scalar_lea.vmem %s4422_s4, %s4128_s16 }
  0x74   : > { %1884 = vmatpush1.bf16.msra.mxu0 %v3469_v23  ;;  %v3570_v23 = vld [vmem:[%s3861_s10 + $0x1f4] ss:$24 sps:$4 sm:$0xff]  }
  0x75   : > { %1885 = vmatprep.subr.bf16.mxu0 %v3480_v25  ;;  %3121 = vmatpush1.bf16.msra.mxu1 %v3845_v39  ;;  %v3508_v39 = vld [vmem:[%s3861_s10 + $0x184] ss:$24 sps:$4 sm:$0xff]   ;;  %v3572_v25 = vld [vmem:[%s3861_s10 + $0x1e8] ss:$24 sps:$4 sm:$0xff]  }
  0x76   : > { %1562 = vmatmul.mubr.bf16.gmra.mrb[20].mxu1 %v3476_v58  ;;  %3106 = vmatprep.subr.bf16.mxu1 %v3850_v41  ;;  %v3510_v41 = vld [vmem:[%s3861_s10 + $0x10] ss:$24 sps:$4 sm:$0xff]  }
  0x77   : > { %1755 = vmatmul.mubr.bf16.gmra.mrb[20].mxu0 %v3477_v60  ;;  %1571 = vmatprep.mubr.bf16.mxu1 %v3484_v27  ;;  %v3573_v58 = vld [vmem:[%s3861_s10 + $0x1f0] ss:$24 sps:$4 sm:$0xff]   ;;  %v3574_v60 = vld [vmem:[%s3861_s10 + $0x21c] ss:$24 sps:$4 sm:$0xff]   ;;  %v3579_v27 = vld [vmem:[%s3861_s10 + $0x220] ss:$24 sps:$4 sm:$0xff]  }
  0x78   : > { %1886 = vmatpush1.bf16.msra.mxu0 %v3478_v62  ;;  %1764 = vmatprep.mubr.bf16.mxu0 %v3486_v4  ;;  %v3576_v62 = vld [vmem:[%s3861_s10 + $0x224] ss:$24 sps:$4 sm:$0xff]  }
  0x79   : > { %1887 = vmatprep.subr.bf16.mxu0 %v3483_v0  ;;  %3122 = vmatpush1.bf16.msra.mxu1 %v3854_v43  ;;  %v3513_v43 = vld [vmem:[%s3861_s10 + $0x180] ss:$24 sps:$4 sm:$0xff]   ;;  %v3580_v4 = vld [vmem:[%s3861_s10 + $0x24c] ss:$24 sps:$4 sm:$0xff]  }
  0x7a   : > { %3107 = vmatprep.subr.bf16.mxu1 %v3865_v45  ;;  %v3514_v45 = vld [vmem:[%s3861_s10 + $0x1b4] ss:$24 sps:$4 sm:$0xff]   ;;  %v3578_v0 = vld [vmem:[%s3861_s10 + $0x218] ss:$24 sps:$4 sm:$0xff]  }
  0x7c   : > { %1888 = vmatpush1.bf16.msra.mxu0 %v3481_v29  ;;  %v3582_v29 = vld [vmem:[%s3861_s10 + $0x254] ss:$24 sps:$4 sm:$0xff]  }
  0x7d   : > { %1889 = vmatprep.subr.bf16.mxu0 %v3492_v31  ;;  %3123 = vmatpush1.bf16.msra.mxu1 %v3869_v47  ;;  %v3518_v47 = vld [vmem:[%s3861_s10 + $0x1b0] ss:$24 sps:$4 sm:$0xff]  }
  0x7e   : > { %1572 = vmatmul.mubr.bf16.gmra.mrb[24].mxu1 %v3488_v6  ;;  %3108 = vmatprep.subr.bf16.mxu1 %v3875_v50  ;;  %v3520_v50 = vld [vmem:[%s3861_s10 + $0x1e4] ss:$24 sps:$4 sm:$0xff]   ;;  %v3584_v31 = vld [vmem:[%s3861_s10 + $0x248] ss:$24 sps:$4 sm:$0xff]  }
  0x7f   : > { %1765 = vmatmul.mubr.bf16.gmra.mrb[24].mxu0 %v3489_v8  ;;  %1581 = vmatprep.mubr.bf16.mxu1 %v3496_v12  ;;  %v3585_v6 = vld [vmem:[%s3861_s10 + $0x250] ss:$24 sps:$4 sm:$0xff]   ;;  %v3586_v8 = vld [vmem:[%s3861_s10 + $0x27c] ss:$24 sps:$4 sm:$0xff]   ;;  %v3591_v12 = vld [vmem:[%s3861_s10 + $0x280] ss:$24 sps:$4 sm:$0xff]  }
  0x80   : > { %1890 = vmatpush1.bf16.msra.mxu0 %v3490_v10  ;;  %1774 = vmatprep.mubr.bf16.mxu0 %v3498_v14  ;;  %v3588_v10 = vld [vmem:[%s3861_s10 + $0x284] ss:$24 sps:$4 sm:$0xff]  }
  0x81   : > { %1891 = vmatprep.subr.bf16.mxu0 %v3495_v33  ;;  %3124 = vmatpush1.bf16.msra.mxu1 %v3881_v53  ;;  %v3524_v53 = vld [vmem:[%s3861_s10 + $0x1e0] ss:$24 sps:$4 sm:$0xff]   ;;  %v3592_v14 = vld [vmem:[%s3861_s10 + $0x2ac] ss:$24 sps:$4 sm:$0xff]  }
  0x82   : > { %3109 = vmatprep.subr.bf16.mxu1 %v3887_v55  ;;  %v3525_v55 = vld [vmem:[%s3861_s10 + $0x70] ss:$24 sps:$4 sm:$0xff]  }
  0x83   : > { %v3590_v33 = vld [vmem:[%s3861_s10 + $0x278] ss:$24 sps:$4 sm:$0xff]  }
  0x84   : > { %1892 = vmatpush1.bf16.msra.mxu0 %v3493_v35  ;;  %v3594_v35 = vld [vmem:[%s3861_s10 + $0x2b4] ss:$24 sps:$4 sm:$0xff]  }
  0x85   : > { %1893 = vmatprep.subr.bf16.mxu0 %v3504_v37  ;;  %3125 = vmatpush1.bf16.msra.mxu1 %v3891_v57  ;;  %v3526_v57 = vld [vmem:[%s3861_s10 + $0x214] ss:$24 sps:$4 sm:$0xff]   ;;  %v3596_v37 = vld [vmem:[%s3861_s10 + $0x2a8] ss:$24 sps:$4 sm:$0xff]  }
  0x86   : > { %1582 = vmatmul.mubr.bf16.gmra.mrb[28].mxu1 %v3500_v16  ;;  %3110 = vmatprep.subr.bf16.mxu1 %v3897_v59  ;;  %v3528_v59 = vld [vmem:[%s3861_s10 + $0xa4] ss:$24 sps:$4 sm:$0xff]   ;;  %v3597_v16 = vld [vmem:[%s3861_s10 + $0x2b0] ss:$24 sps:$4 sm:$0xff]  }
  0x87   : > { %1775 = vmatmul.mubr.bf16.gmra.mrb[28].mxu0 %v3501_v18  ;;  %1591 = vmatprep.mubr.bf16.mxu1 %v3508_v39  ;;  %v3598_v18 = vld [vmem:[%s3861_s10 + $0x2dc] ss:$24 sps:$4 sm:$0xff]   ;;  %v3603_v39 = vld [vmem:[%s3861_s10 + $0x2e0] ss:$24 sps:$4 sm:$0xff]  }
  0x88   : > { %1894 = vmatpush1.bf16.msra.mxu0 %v3502_v20  ;;  %1897 = vmatprep.mubr.bf16.mxu0 %v3512_v1  ;;  %v3600_v20 = vld [vmem:[%s3861_s10 + $0x2e4] ss:$24 sps:$4 sm:$0xff]  }
  0x89   : > { %1895 = vmatprep.subr.bf16.mxu0 %v3507_v22  ;;  %3126 = vmatpush1.bf16.msra.mxu1 %v3901_v61  ;;  %v3530_v61 = vld [vmem:[%s3861_s10 + $0x210] ss:$24 sps:$4 sm:$0xff]  }
  0x8a   : > { %3111 = vmatprep.subr.bf16.mxu1 %v3907_v63  ;;  %v3534_v63 = vld [vmem:[%s3861_s10 + $0xd4] ss:$24 sps:$4 sm:$0xff]   ;;  %v3602_v22 = vld [vmem:[%s3861_s10 + $0x2d8] ss:$24 sps:$4 sm:$0xff]  }
  0x8c   : > { %1896 = vmatpush1.bf16.msra.mxu0 %v3505_v24 }
  0x8d   : > { %3127 = vmatpush1.bf16.msra.mxu1 %v3912_v2  ;;  %v3536_v2 = vld [vmem:[%s3861_s10 + $0x240] ss:$24 sps:$4 sm:$0xff]  }
  0x8e   : > { %1592 = vmatmul.mubr.bf16.gmra.mrb[32].mxu1 %v3513_v43 }
  0x8f   : > { %1898 = vmatmul.mubr.bf16.vlgmr.msra.gmra.mrb[0].mxu0 %v3510_v41  ;;  %1601 = vmatprep.mubr.bf16.mxu1 %v3514_v45 }
  0x90   : > { %1907 = vmatprep.mubr.bf16.mxu0 %v3516_v26 }
  0x96   : > { %1602 = vmatmul.mubr.bf16.gmra.mrb[36].mxu1 %v3518_v47 }
  0x97   : > { %1908 = vmatmul.mubr.bf16.gmra.mrb[4].mxu0 %v3519_v3  ;;  %1611 = vmatprep.mubr.bf16.mxu1 %v3520_v50 }
  0x98   : > { %1917 = vmatprep.mubr.bf16.mxu0 %v3522_v28 }
  0x9e   : > { %1612 = vmatmul.mubr.bf16.gmra.mrb[40].mxu1 %v3524_v53 }
  0x9f   : > { %1918 = vmatmul.mubr.bf16.gmra.mrb[8].mxu0 %v3525_v55  ;;  %1621 = vmatprep.mubr.bf16.mxu1 %v3526_v57 }
  0xa0   : > { %1927 = vmatprep.mubr.bf16.mxu0 %v3528_v59 }
  0xa6   : > { %1622 = vmatmul.mubr.bf16.gmra.mrb[44].mxu1 %v3530_v61 }
  0xa7   : > { %1928 = vmatmul.mubr.bf16.gmra.mrb[12].mxu0 %v3531_v5  ;;  %1631 = vmatprep.mubr.bf16.mxu1 %v3532_v30 }
  0xa8   : > { %1937 = vmatprep.mubr.bf16.mxu0 %v3534_v63 }
  0xae   : > { %1632 = vmatmul.mubr.bf16.gmra.mrb[48].mxu1 %v3536_v2 }
  0xaf   : > { %1938 = vmatmul.mubr.bf16.gmra.mrb[16].mxu0 %v3537_v32  ;;  %1641 = vmatprep.mubr.bf16.mxu1 %v3538_v7 }
  0xb0   : > { %1947 = vmatprep.mubr.bf16.mxu0 %v3540_v34 }
  0xb6   : > { %1642 = vmatmul.mubr.bf16.gmra.mrb[52].mxu1 %v3542_v36 }
  0xb7   : > { %1948 = vmatmul.mubr.bf16.gmra.mrb[20].mxu0 %v3543_v9  ;;  %1651 = vmatprep.mubr.bf16.mxu1 %v3544_v38 }
  0xb8   : > { %1957 = vmatprep.mubr.bf16.mxu0 %v3546_v11 }
  0xbe   : > { %1652 = vmatmul.mubr.bf16.gmra.mrb[56].mxu1 %v3548_v13 }
  0xbf   : > { %1958 = vmatmul.mubr.bf16.gmra.mrb[24].mxu0 %v3549_v40  ;;  %1661 = vmatprep.mubr.bf16.mxu1 %v3550_v42 }
  0xc0   : > { %1967 = vmatprep.mubr.bf16.mxu0 %v3552_v44 }
  0xc6   : > { %1662 = vmatmul.mubr.bf16.gmra.mrb[60].mxu1 %v3554_v46 }
  0xc7   : > { %1968 = vmatmul.mubr.bf16.gmra.mrb[28].mxu0 %v3555_v15  ;;  %1784 = vmatprep.mubr.bf16.mxu1 %v3558_v48 }
  0xc8   : > { %1977 = vmatprep.mubr.bf16.mxu0 %v3559_v17 }
  0xce   : > { %1785 = vmatmul.mubr.bf16.vlgmr.msra.gmra.mrb[32].mxu1 %v3556_v19 }
  0xcf   : > { %1978 = vmatmul.mubr.bf16.gmra.mrb[32].mxu0 %v3561_v49  ;;  %1794 = vmatprep.mubr.bf16.mxu1 %v3562_v51 }
  0xd0   : > { %1987 = vmatprep.mubr.bf16.mxu0 %v3564_v52 }
  0xd6   : > { %1795 = vmatmul.mubr.bf16.gmra.mrb[36].mxu1 %v3566_v21 }
  0xd7   : > { %1988 = vmatmul.mubr.bf16.gmra.mrb[36].mxu0 %v3567_v54  ;;  %1804 = vmatprep.mubr.bf16.mxu1 %v3568_v56 }
  0xd8   : > { %1997 = vmatprep.mubr.bf16.mxu0 %v3570_v23 }
  0xde   : > { %1805 = vmatmul.mubr.bf16.gmra.mrb[40].mxu1 %v3572_v25 }
  0xdf   : > { %1998 = vmatmul.mubr.bf16.gmra.mrb[40].mxu0 %v3573_v58  ;;  %1814 = vmatprep.mubr.bf16.mxu1 %v3574_v60 }
  0xe0   : > { %2007 = vmatprep.mubr.bf16.mxu0 %v3576_v62 }
  0xe6   : > { %1815 = vmatmul.mubr.bf16.gmra.mrb[44].mxu1 %v3578_v0 }
  0xe7   : > { %2008 = vmatmul.mubr.bf16.gmra.mrb[44].mxu0 %v3579_v27  ;;  %1824 = vmatprep.mubr.bf16.mxu1 %v3580_v4 }
  0xe8   : > { %2017 = vmatprep.mubr.bf16.mxu0 %v3582_v29 }
  0xee   : > { %1825 = vmatmul.mubr.bf16.gmra.mrb[48].mxu1 %v3584_v31 }
  0xef   : > { %2018 = vmatmul.mubr.bf16.gmra.mrb[48].mxu0 %v3585_v6  ;;  %1834 = vmatprep.mubr.bf16.mxu1 %v3586_v8 }
  0xf0   : > { %2027 = vmatprep.mubr.bf16.mxu0 %v3588_v10 }
  0xf6   : > { %1835 = vmatmul.mubr.bf16.gmra.mrb[52].mxu1 %v3590_v33 }
  0xf7   : > { %2028 = vmatmul.mubr.bf16.gmra.mrb[52].mxu0 %v3591_v12  ;;  %1844 = vmatprep.mubr.bf16.mxu1 %v3592_v14 }
  0xf8   : > { %2037 = vmatprep.mubr.bf16.mxu0 %v3594_v35 }
  0xfe   : > { %1845 = vmatmul.mubr.bf16.gmra.mrb[56].mxu1 %v3596_v37 }
  0xff   : > { %2038 = vmatmul.mubr.bf16.gmra.mrb[56].mxu0 %v3597_v16  ;;  %1854 = vmatprep.mubr.bf16.mxu1 %v3598_v18 }
 0x100   : > { %2047 = vmatprep.mubr.bf16.mxu0 %v3600_v20 }
 0x106   : > { %1855 = vmatmul.mubr.bf16.gmra.mrb[60].mxu1 %v3602_v22 }
 0x107   : > { %2048 = vmatmul.mubr.bf16.gmra.mrb[60].mxu0 %v3603_v39 }
 0x121   : > { %v1513_v1 = vpop.f32.mrb[0].mxu1 }
 0x122   : > { %v1515_v24 = vpop.f32.mrb[1].mxu1 }
 0x123   : > { %v1517_v41 = vpop.f32.mrb[2].mxu1 }
 0x124   : > { %v1519_v43 = vpop.f32.mrb[3].mxu1 }
 0x129   : > { %v1523_v45 = vpop.f32.mrb[4].mxu1 }
 0x12a   : > { %v1525_v26 = vpop.f32.mrb[5].mxu1 }
 0x12b   : > { %v1527_v47 = vpop.f32.mrb[6].mxu1 }
 0x12c   : > { %v4074_v3 = vpop.f32.mrb[7].mxu1 }
 0x131   : > { %v4076_v50 = vpop.f32.mrb[8].mxu1 }
 0x132   : > { %v4078_v28 = vpop.f32.mrb[9].mxu1 }
 0x133   : > { %v4080_v53 = vpop.f32.mrb[10].mxu1 }
 0x134   : > { %v4082_v55 = vpop.f32.mrb[11].mxu1 }
 0x139   : > { %v4084_v57 = vpop.f32.mrb[12].mxu1 }
 0x13a   : > { %v4086_v59 = vpop.f32.mrb[13].mxu1 }
 0x13b   : > { %v4088_v61 = vpop.f32.mrb[14].mxu1 }
 0x13c   : > { %v4090_v5 = vpop.f32.mrb[15].mxu1 }
 0x141   : > { %v4092_v30 = vpop.f32.mrb[16].mxu1 }
 0x142   : > { %v4094_v63 = vpop.f32.mrb[17].mxu1 }
 0x143   : > { %v4096_v2 = vpop.f32.mrb[18].mxu1 }
 0x144   : > { %v4098_v32 = vpop.f32.mrb[19].mxu1 }
 0x149   : > { %v4100_v7 = vpop.f32.mrb[20].mxu1 }
 0x14a   : > { %v4102_v34 = vpop.f32.mrb[21].mxu1 }
 0x14b   : > { %v4104_v36 = vpop.f32.mrb[22].mxu1 }
 0x14c   : > { %v4106_v9 = vpop.f32.mrb[23].mxu1 }
 0x151   : > { %v4109_v38 = vpop.f32.mrb[24].mxu1 }
 0x152   : > { %v4111_v11 = vpop.f32.mrb[25].mxu1 }
 0x153   : > { %v4113_v13 = vpop.f32.mrb[26].mxu1 }
 0x154   : > { %v4116_v40 = vpop.f32.mrb[27].mxu1 }
 0x159   : > { %v4118_v42 = vpop.f32.mrb[28].mxu1 }
 0x15a   : > { %v4121_v44 = vpop.f32.mrb[29].mxu1 }
 0x15b   : > { %v4124_v46 = vpop.f32.mrb[30].mxu1 }
 0x15c   : > { %v4126_v15 = vpop.f32.mrb[31].mxu1 }
 0x162   : > { %v1899_v48 = vpop.f32.mrb[0].mxu0 }
 0x163   : > { %v3128_v17 = vadd.f32 %v1899_v48, %v1513_v1  ;;  %v1901_v19 = vpop.f32.mrb[1].mxu0 }
 0x164   : > { %v3129_v49 = vadd.f32 %v1901_v19, %v1515_v24  ;;  %v1903_v51 = vpop.f32.mrb[2].mxu0 }
 0x165   : > { %v3032_v52 = vpack.c.bf16 %v3128_v17, %v3128_v17  ;;  %v3130_v21 = vadd.f32 %v1903_v51, %v1517_v41  ;;  %v1905_v54 = vpop.f32.mrb[3].mxu0 }
 0x166   : > { %v3064_v56 = vpack.c.bf16 %v3129_v49, %v3129_v49  ;;  %v3131_v23 = vadd.f32 %v1905_v54, %v1519_v43 }
 0x167   : > { %2187 = vst.msk [vmem:[%s4134_s26] sm:$0xf] %vm2186_vm0, %v3032_v52  ;;  %v3033_v25 = vpack.c.bf16 %v3130_v21, %v3130_v21  ;;  %2219 = vrot.lane.b32.xlu0 %v3032_v52, %s3660_s29 }
 0x168   : > { %2475 = vst.msk [vmem:[%s4140_s28] sm:$0xf] %vm2186_vm0, %v3064_v56  ;;  %v3065_v58 = vpack.c.bf16 %v3131_v23, %v3131_v23 }
 0x169   : > { %2188 = vst.msk [vmem:[%s4134_s26 + $0x4] sm:$0xf] %vm2186_vm0, %v3033_v25 }
 0x16a   : > { %2476 = vst.msk [vmem:[%s4140_s28 + $0x4] sm:$0xf] %vm2186_vm0, %v3065_v58  ;;  %v1909_v60 = vpop.f32.mrb[4].mxu0 }
 0x16b   : > { %v3132_v62 = vadd.f32 %v1909_v60, %v1523_v45  ;;  %v1911_v0 = vpop.f32.mrb[5].mxu0  ;;  %2221 = vrot.lane.b32.xlu0 %v3033_v25, %s3660_s29 }
 0x16c   : > { %v3133_v27 = vadd.f32 %v1911_v0, %v1525_v26  ;;  %v1913_v4 = vpop.f32.mrb[6].mxu0 }
 0x16d   : > { %v3034_v29 = vpack.c.bf16 %v3132_v62, %v3132_v62  ;;  %v3134_v31 = vadd.f32 %v1913_v4, %v1527_v47  ;;  %v1915_v6 = vpop.f32.mrb[7].mxu0 }
 0x16e   : > { %v3066_v8 = vpack.c.bf16 %v3133_v27, %v3133_v27  ;;  %v3135_v10 = vadd.f32 %v1915_v6, %v4074_v3 }
 0x16f   : > { %2189 = vst.msk [vmem:[%s4134_s26 + $0x8] sm:$0xf] %vm2186_vm0, %v3034_v29  ;;  %v3035_v33 = vpack.c.bf16 %v3134_v31, %v3134_v31  ;;  %2223 = vrot.lane.b32.xlu1 %v3034_v29, %s3660_s29 }
 0x170   : > { %2477 = vst.msk [vmem:[%s4140_s28 + $0x8] sm:$0xf] %vm2186_vm0, %v3066_v8  ;;  %v3067_v12 = vpack.c.bf16 %v3135_v10, %v3135_v10 }
 0x171   : > { %2190 = vst.msk [vmem:[%s4134_s26 + $0xc] sm:$0xf] %vm2186_vm0, %v3035_v33 }
 0x172   : > { %2478 = vst.msk [vmem:[%s4140_s28 + $0xc] sm:$0xf] %vm2186_vm0, %v3067_v12  ;;  %v1919_v14 = vpop.f32.mrb[8].mxu0 }
 0x173   : > { %v3136_v35 = vadd.f32 %v1919_v14, %v4076_v50  ;;  %v1921_v37 = vpop.f32.mrb[9].mxu0  ;;  %2225 = vrot.lane.b32.xlu1 %v3035_v33, %s3660_s29 }
 0x174   : > { %v3137_v16 = vadd.f32 %v1921_v37, %v4078_v28  ;;  %v1923_v18 = vpop.f32.mrb[10].mxu0 }
 0x175   : > { %v3036_v20 = vpack.c.bf16 %v3136_v35, %v3136_v35  ;;  %v3138_v22 = vadd.f32 %v1923_v18, %v4080_v53  ;;  %v1925_v39 = vpop.f32.mrb[11].mxu0 }
 0x176   : > { %v3068_v1 = vpack.c.bf16 %v3137_v16, %v3137_v16  ;;  %v3139_v24 = vadd.f32 %v1925_v39, %v4082_v55 }
 0x177   : > { %2191 = vst.msk [vmem:[%s4134_s26 + $0x10] sm:$0xf] %vm2186_vm0, %v3036_v20  ;;  %v3037_v41 = vpack.c.bf16 %v3138_v22, %v3138_v22  ;;  %2227 = vrot.lane.b32.xlu0 %v3036_v20, %s3660_s29 }
 0x178   : > { %2479 = vst.msk [vmem:[%s4140_s28 + $0x10] sm:$0xf] %vm2186_vm0, %v3068_v1  ;;  %v3069_v43 = vpack.c.bf16 %v3139_v24, %v3139_v24 }
 0x179   : > { %2192 = vst.msk [vmem:[%s4134_s26 + $0x14] sm:$0xf] %vm2186_vm0, %v3037_v41  ;;  %2229 = vrot.lane.b32.xlu1 %v3037_v41, %s3660_s29 }
 0x17a   : > { %2480 = vst.msk [vmem:[%s4140_s28 + $0x14] sm:$0xf] %vm2186_vm0, %v3069_v43  ;;  %v1929_v45 = vpop.f32.mrb[12].mxu0 }
 0x17b   : > { %v3140_v26 = vadd.f32 %v1929_v45, %v4084_v57  ;;  %v1931_v47 = vpop.f32.mrb[13].mxu0 }
 0x17c   : > { %v3141_v3 = vadd.f32 %v1931_v47, %v4086_v59  ;;  %v1933_v50 = vpop.f32.mrb[14].mxu0 }
 0x17d   : > { %v3038_v28 = vpack.c.bf16 %v3140_v26, %v3140_v26  ;;  %v3142_v53 = vadd.f32 %v1933_v50, %v4088_v61  ;;  %v1935_v55 = vpop.f32.mrb[15].mxu0 }
 0x17e   : > { %v3070_v48 = vpack.c.bf16 %v3141_v3, %v3141_v3  ;;  %v3143_v17 = vadd.f32 %v1935_v55, %v4090_v5 }
 0x17f   : > { %2193 = vst.msk [vmem:[%s4134_s26 + $0x18] sm:$0xf] %vm2186_vm0, %v3038_v28  ;;  %v3039_v19 = vpack.c.bf16 %v3142_v53, %v3142_v53  ;;  %2231 = vrot.lane.b32.xlu0 %v3038_v28, %s3660_s29 }
 0x180   : > { %2481 = vst.msk [vmem:[%s4140_s28 + $0x18] sm:$0xf] %vm2186_vm0, %v3070_v48  ;;  %v3071_v57 = vpack.c.bf16 %v3143_v17, %v3143_v17 }
 0x181   : > { %2194 = vst.msk [vmem:[%s4134_s26 + $0x1c] sm:$0xf] %vm2186_vm0, %v3039_v19  ;;  %2233 = vrot.lane.b32.xlu1 %v3039_v19, %s3660_s29 }
 0x182   : > { %2482 = vst.msk [vmem:[%s4140_s28 + $0x1c] sm:$0xf] %vm2186_vm0, %v3071_v57  ;;  %v1939_v59 = vpop.f32.mrb[16].mxu0 }
 0x183   : > { %v3144_v61 = vadd.f32 %v1939_v59, %v4092_v30  ;;  %v1941_v5 = vpop.f32.mrb[17].mxu0 }
 0x184   : > { %v3145_v49 = vadd.f32 %v1941_v5, %v4094_v63  ;;  %v1943_v51 = vpop.f32.mrb[18].mxu0 }
 0x185   : > { %v3040_v52 = vpack.c.bf16 %v3144_v61, %v3144_v61  ;;  %v3146_v21 = vadd.f32 %v1943_v51, %v4096_v2  ;;  %v1945_v54 = vpop.f32.mrb[19].mxu0 }
 0x186   : > { %v3072_v56 = vpack.c.bf16 %v3145_v49, %v3145_v49  ;;  %v3147_v23 = vadd.f32 %v1945_v54, %v4098_v32 }
 0x187   : > { %2195 = vst.msk [vmem:[%s4134_s26 + $0x20] sm:$0xf] %vm2186_vm0, %v3040_v52  ;;  %v3041_v25 = vpack.c.bf16 %v3146_v21, %v3146_v21  ;;  %2235 = vrot.lane.b32.xlu0 %v3040_v52, %s3660_s29 }
 0x188   : > { %2483 = vst.msk [vmem:[%s4140_s28 + $0x20] sm:$0xf] %vm2186_vm0, %v3072_v56  ;;  %v3073_v30 = vpack.c.bf16 %v3147_v23, %v3147_v23 }
 0x189   : > { %2196 = vst.msk [vmem:[%s4134_s26 + $0x24] sm:$0xf] %vm2186_vm0, %v3041_v25  ;;  %2237 = vrot.lane.b32.xlu1 %v3041_v25, %s3660_s29 }
 0x18a   : > { %2484 = vst.msk [vmem:[%s4140_s28 + $0x24] sm:$0xf] %vm2186_vm0, %v3073_v30  ;;  %v1949_v63 = vpop.f32.mrb[20].mxu0 }
 0x18b   : > { %v3148_v2 = vadd.f32 %v1949_v63, %v4100_v7  ;;  %v1951_v32 = vpop.f32.mrb[21].mxu0 }
 0x18c   : > { %v3149_v58 = vadd.f32 %v1951_v32, %v4102_v34  ;;  %v1953_v60 = vpop.f32.mrb[22].mxu0 }
 0x18d   : > { %v3042_v62 = vpack.c.bf16 %v3148_v2, %v3148_v2  ;;  %v3150_v0 = vadd.f32 %v1953_v60, %v4104_v36  ;;  %v1955_v27 = vpop.f32.mrb[23].mxu0 }
 0x18e   : > { %v3074_v4 = vpack.c.bf16 %v3149_v58, %v3149_v58  ;;  %v3151_v29 = vadd.f32 %v1955_v27, %v4106_v9 }
 0x18f   : > { %2197 = vst.msk [vmem:[%s4134_s26 + $0x28] sm:$0xf] %vm2186_vm0, %v3042_v62  ;;  %v3043_v31 = vpack.c.bf16 %v3150_v0, %v3150_v0  ;;  %2239 = vrot.lane.b32.xlu0 %v3042_v62, %s3660_s29 }
 0x190   : > { %2485 = vst.msk [vmem:[%s4140_s28 + $0x28] sm:$0xf] %vm2186_vm0, %v3074_v4  ;;  %v3075_v7 = vpack.c.bf16 %v3151_v29, %v3151_v29 }
 0x191   : > { %2198 = vst.msk [vmem:[%s4134_s26 + $0x2c] sm:$0xf] %vm2186_vm0, %v3043_v31  ;;  %2241 = vrot.lane.b32.xlu1 %v3043_v31, %s3660_s29 }
 0x192   : > { %2486 = vst.msk [vmem:[%s4140_s28 + $0x2c] sm:$0xf] %vm2186_vm0, %v3075_v7  ;;  %v1959_v34 = vpop.f32.mrb[24].mxu0 }
 0x193   : > { %v3152_v36 = vadd.f32 %v1959_v34, %v4109_v38  ;;  %v1961_v9 = vpop.f32.mrb[25].mxu0 }
 0x194   : > { %v3153_v6 = vadd.f32 %v1961_v9, %v4111_v11  ;;  %v1963_v8 = vpop.f32.mrb[26].mxu0 }
 0x195   : > { %v3044_v10 = vpack.c.bf16 %v3152_v36, %v3152_v36  ;;  %v3154_v33 = vadd.f32 %v1963_v8, %v4113_v13  ;;  %v1965_v12 = vpop.f32.mrb[27].mxu0 }
 0x196   : > { %v3076_v14 = vpack.c.bf16 %v3153_v6, %v3153_v6  ;;  %v3155_v35 = vadd.f32 %v1965_v12, %v4116_v40 }
 0x197   : > { %2199 = vst.msk [vmem:[%s4134_s26 + $0x30] sm:$0xf] %vm2186_vm0, %v3044_v10  ;;  %v3045_v37 = vpack.c.bf16 %v3154_v33, %v3154_v33  ;;  %2243 = vrot.lane.b32.xlu0 %v3044_v10, %s3660_s29 }
 0x198   : > { %2487 = vst.msk [vmem:[%s4140_s28 + $0x30] sm:$0xf] %vm2186_vm0, %v3076_v14  ;;  %v3077_v38 = vpack.c.bf16 %v3155_v35, %v3155_v35 }
 0x199   : > { %2200 = vst.msk [vmem:[%s4134_s26 + $0x34] sm:$0xf] %vm2186_vm0, %v3045_v37  ;;  %2245 = vrot.lane.b32.xlu1 %v3045_v37, %s3660_s29 }
 0x19a   : > { %2488 = vst.msk [vmem:[%s4140_s28 + $0x34] sm:$0xf] %vm2186_vm0, %v3077_v38  ;;  %v1969_v11 = vpop.f32.mrb[28].mxu0 }
 0x19b   : > { %v3156_v13 = vadd.f32 %v1969_v11, %v4118_v42  ;;  %v1971_v40 = vpop.f32.mrb[29].mxu0 }
 0x19c   : > { %v3157_v16 = vadd.f32 %v1971_v40, %v4121_v44  ;;  %v1973_v18 = vpop.f32.mrb[30].mxu0 }
 0x19d   : > { %v3046_v20 = vpack.c.bf16 %v3156_v13, %v3156_v13  ;;  %v3158_v22 = vadd.f32 %v1973_v18, %v4124_v46  ;;  %v1975_v39 = vpop.f32.mrb[31].mxu0 }
 0x19e   : > { %v3078_v1 = vpack.c.bf16 %v3157_v16, %v3157_v16  ;;  %v3159_v24 = vadd.f32 %v1975_v39, %v4126_v15 }
 0x19f   : > { %2201 = vst.msk [vmem:[%s4134_s26 + $0x38] sm:$0xf] %vm2186_vm0, %v3046_v20  ;;  %v3047_v41 = vpack.c.bf16 %v3158_v22, %v3158_v22  ;;  %2247 = vrot.lane.b32.xlu0 %v3046_v20, %s3660_s29 }
 0x1a0   : > { %2489 = vst.msk [vmem:[%s4140_s28 + $0x38] sm:$0xf] %vm2186_vm0, %v3078_v1  ;;  %v3079_v42 = vpack.c.bf16 %v3159_v24, %v3159_v24 }
 0x1a1   : > { %2202 = vst.msk [vmem:[%s4134_s26 + $0x3c] sm:$0xf] %vm2186_vm0, %v3047_v41  ;;  %2249 = vrot.lane.b32.xlu1 %v3047_v41, %s3660_s29  ;;  %v1786_v44 = vpop.f32.mrb[32].mxu1 }
 0x1a2   : > { %2490 = vst.msk [vmem:[%s4140_s28 + $0x3c] sm:$0xf] %vm2186_vm0, %v3079_v42  ;;  %v1979_v46 = vpop.f32.mrb[32].mxu0  ;;  %v1788_v15 = vpop.f32.mrb[33].mxu1 }
 0x1a3   : > { %v3160_v43 = vadd.f32 %v1979_v46, %v1786_v44  ;;  %v1981_v45 = vpop.f32.mrb[33].mxu0  ;;  %v1790_v47 = vpop.f32.mrb[34].mxu1 }
 0x1a4   : > { %v3161_v26 = vadd.f32 %v1981_v45, %v1788_v15  ;;  %v1983_v3 = vpop.f32.mrb[34].mxu0  ;;  %v1792_v53 = vpop.f32.mrb[35].mxu1 }
 0x1a5   : > { %v3048_v50 = vpack.c.bf16 %v3160_v43, %v3160_v43  ;;  %v3162_v28 = vadd.f32 %v1983_v3, %v1790_v47  ;;  %v1985_v55 = vpop.f32.mrb[35].mxu0 }
 0x1a6   : > { %v3080_v48 = vpack.c.bf16 %v3161_v26, %v3161_v26  ;;  %v3163_v17 = vadd.f32 %v1985_v55, %v1792_v53 }
 0x1a7   : > { %2203 = vst.msk [vmem:[%s4134_s26 + $0x40] sm:$0xf] %vm2186_vm0, %v3048_v50  ;;  %v3049_v19 = vpack.c.bf16 %v3162_v28, %v3162_v28  ;;  %2251 = vrot.lane.b32.xlu0 %v3048_v50, %s3660_s29 }
 0x1a8   : > { %2491 = vst.msk [vmem:[%s4140_s28 + $0x40] sm:$0xf] %vm2186_vm0, %v3080_v48  ;;  %v3081_v57 = vpack.c.bf16 %v3163_v17, %v3163_v17 }
 0x1a9   : > { %2204 = vst.msk [vmem:[%s4134_s26 + $0x44] sm:$0xf] %vm2186_vm0, %v3049_v19  ;;  %2253 = vrot.lane.b32.xlu1 %v3049_v19, %s3660_s29  ;;  %v1796_v59 = vpop.f32.mrb[36].mxu1 }
 0x1aa   : > { %2492 = vst.msk [vmem:[%s4140_s28 + $0x44] sm:$0xf] %vm2186_vm0, %v3081_v57  ;;  %v1989_v61 = vpop.f32.mrb[36].mxu0  ;;  %v1798_v49 = vpop.f32.mrb[37].mxu1 }
 0x1ab   : > { %v3164_v5 = vadd.f32 %v1989_v61, %v1796_v59  ;;  %v1991_v51 = vpop.f32.mrb[37].mxu0  ;;  %v1800_v21 = vpop.f32.mrb[38].mxu1 }
 0x1ac   : > { %v3165_v52 = vadd.f32 %v1991_v51, %v1798_v49  ;;  %v1993_v54 = vpop.f32.mrb[38].mxu0  ;;  %v1802_v25 = vpop.f32.mrb[39].mxu1 }
 0x1ad   : > { %v3050_v56 = vpack.c.bf16 %v3164_v5, %v3164_v5  ;;  %v3166_v23 = vadd.f32 %v1993_v54, %v1800_v21  ;;  %v1995_v30 = vpop.f32.mrb[39].mxu0 }
 0x1ae   : > { %v3082_v63 = vpack.c.bf16 %v3165_v52, %v3165_v52  ;;  %v3167_v2 = vadd.f32 %v1995_v30, %v1802_v25 }
 0x1af   : > { %2205 = vst.msk [vmem:[%s4134_s26 + $0x48] sm:$0xf] %vm2186_vm0, %v3050_v56  ;;  %v3051_v32 = vpack.c.bf16 %v3166_v23, %v3166_v23  ;;  %2255 = vrot.lane.b32.xlu0 %v3050_v56, %s3660_s29 }
 0x1b0   : > { %2493 = vst.msk [vmem:[%s4140_s28 + $0x48] sm:$0xf] %vm2186_vm0, %v3082_v63  ;;  %v3083_v58 = vpack.c.bf16 %v3167_v2, %v3167_v2 }
 0x1b1   : > { %2206 = vst.msk [vmem:[%s4134_s26 + $0x4c] sm:$0xf] %vm2186_vm0, %v3051_v32  ;;  %2257 = vrot.lane.b32.xlu1 %v3051_v32, %s3660_s29  ;;  %v1806_v60 = vpop.f32.mrb[40].mxu1 }
 0x1b2   : > { %2494 = vst.msk [vmem:[%s4140_s28 + $0x4c] sm:$0xf] %vm2186_vm0, %v3083_v58  ;;  %v1999_v62 = vpop.f32.mrb[40].mxu0  ;;  %v1808_v27 = vpop.f32.mrb[41].mxu1 }
 0x1b3   : > { %v3168_v0 = vadd.f32 %v1999_v62, %v1806_v60  ;;  %v2001_v4 = vpop.f32.mrb[41].mxu0  ;;  %v1810_v31 = vpop.f32.mrb[42].mxu1 }
 0x1b4   : > { %v3169_v29 = vadd.f32 %v2001_v4, %v1808_v27  ;;  %v2003_v7 = vpop.f32.mrb[42].mxu0  ;;  %v1812_v9 = vpop.f32.mrb[43].mxu1 }
 0x1b5   : > { %v3052_v34 = vpack.c.bf16 %v3168_v0, %v3168_v0  ;;  %v3170_v36 = vadd.f32 %v2003_v7, %v1810_v31  ;;  %v2005_v6 = vpop.f32.mrb[43].mxu0 }
 0x1b6   : > { %v3084_v8 = vpack.c.bf16 %v3169_v29, %v3169_v29  ;;  %v3171_v10 = vadd.f32 %v2005_v6, %v1812_v9 }
 0x1b7   : > { %2207 = vst.msk [vmem:[%s4134_s26 + $0x50] sm:$0xf] %vm2186_vm0, %v3052_v34  ;;  %v3053_v33 = vpack.c.bf16 %v3170_v36, %v3170_v36  ;;  %2259 = vrot.lane.b32.xlu0 %v3052_v34, %s3660_s29 }
 0x1b8   : > { %2495 = vst.msk [vmem:[%s4140_s28 + $0x50] sm:$0xf] %vm2186_vm0, %v3084_v8  ;;  %v3085_v12 = vpack.c.bf16 %v3171_v10, %v3171_v10 }
 0x1b9   : > { %2208 = vst.msk [vmem:[%s4134_s26 + $0x54] sm:$0xf] %vm2186_vm0, %v3053_v33  ;;  %2261 = vrot.lane.b32.xlu1 %v3053_v33, %s3660_s29  ;;  %v1816_v14 = vpop.f32.mrb[44].mxu1 }
 0x1ba   : > { %2496 = vst.msk [vmem:[%s4140_s28 + $0x54] sm:$0xf] %vm2186_vm0, %v3085_v12  ;;  %v2009_v35 = vpop.f32.mrb[44].mxu0  ;;  %v1818_v38 = vpop.f32.mrb[45].mxu1 }
 0x1bb   : > { %v3172_v37 = vadd.f32 %v2009_v35, %v1816_v14  ;;  %v2011_v11 = vpop.f32.mrb[45].mxu0  ;;  %v1820_v40 = vpop.f32.mrb[46].mxu1 }
 0x1bc   : > { %v3173_v13 = vadd.f32 %v2011_v11, %v1818_v38  ;;  %v2013_v16 = vpop.f32.mrb[46].mxu0  ;;  %v1822_v22 = vpop.f32.mrb[47].mxu1 }
 0x1bd   : > { %v3054_v18 = vpack.c.bf16 %v3172_v37, %v3172_v37  ;;  %v3174_v20 = vadd.f32 %v2013_v16, %v1820_v40  ;;  %v2015_v39 = vpop.f32.mrb[47].mxu0 }
 0x1be   : > { %v3086_v1 = vpack.c.bf16 %v3173_v13, %v3173_v13  ;;  %v3175_v24 = vadd.f32 %v2015_v39, %v1822_v22 }
 0x1bf   : > { %2209 = vst.msk [vmem:[%s4134_s26 + $0x58] sm:$0xf] %vm2186_vm0, %v3054_v18  ;;  %v3055_v41 = vpack.c.bf16 %v3174_v20, %v3174_v20  ;;  %2263 = vrot.lane.b32.xlu0 %v3054_v18, %s3660_s29 }
 0x1c0   : > { %2497 = vst.msk [vmem:[%s4140_s28 + $0x58] sm:$0xf] %vm2186_vm0, %v3086_v1  ;;  %v3087_v42 = vpack.c.bf16 %v3175_v24, %v3175_v24 }
 0x1c1   : > { %2210 = vst.msk [vmem:[%s4134_s26 + $0x5c] sm:$0xf] %vm2186_vm0, %v3055_v41  ;;  %2265 = vrot.lane.b32.xlu1 %v3055_v41, %s3660_s29  ;;  %v1826_v44 = vpop.f32.mrb[48].mxu1 }
 0x1c2   : > { %2498 = vst.msk [vmem:[%s4140_s28 + $0x5c] sm:$0xf] %vm2186_vm0, %v3087_v42  ;;  %v2019_v46 = vpop.f32.mrb[48].mxu0  ;;  %v1828_v15 = vpop.f32.mrb[49].mxu1 }
 0x1c3   : > { %v3176_v43 = vadd.f32 %v2019_v46, %v1826_v44  ;;  %v2021_v45 = vpop.f32.mrb[49].mxu0  ;;  %v1830_v47 = vpop.f32.mrb[50].mxu1 }
 0x1c4   : > { %v3177_v26 = vadd.f32 %v2021_v45, %v1828_v15  ;;  %v2023_v3 = vpop.f32.mrb[50].mxu0  ;;  %v1832_v53 = vpop.f32.mrb[51].mxu1 }
 0x1c5   : > { %v3056_v50 = vpack.c.bf16 %v3176_v43, %v3176_v43  ;;  %v3178_v28 = vadd.f32 %v2023_v3, %v1830_v47  ;;  %v2025_v55 = vpop.f32.mrb[51].mxu0 }
 0x1c6   : > { %v3088_v48 = vpack.c.bf16 %v3177_v26, %v3177_v26  ;;  %v3179_v17 = vadd.f32 %v2025_v55, %v1832_v53 }
 0x1c7   : > { %2211 = vst.msk [vmem:[%s4134_s26 + $0x60] sm:$0xf] %vm2186_vm0, %v3056_v50  ;;  %v3057_v19 = vpack.c.bf16 %v3178_v28, %v3178_v28  ;;  %2267 = vrot.lane.b32.xlu0 %v3056_v50, %s3660_s29 }
 0x1c8   : > { %2499 = vst.msk [vmem:[%s4140_s28 + $0x60] sm:$0xf] %vm2186_vm0, %v3088_v48  ;;  %v3089_v57 = vpack.c.bf16 %v3179_v17, %v3179_v17 }
 0x1c9   : > { %2212 = vst.msk [vmem:[%s4134_s26 + $0x64] sm:$0xf] %vm2186_vm0, %v3057_v19  ;;  %2269 = vrot.lane.b32.xlu1 %v3057_v19, %s3660_s29  ;;  %v1836_v59 = vpop.f32.mrb[52].mxu1 }
 0x1ca   : > { %2500 = vst.msk [vmem:[%s4140_s28 + $0x64] sm:$0xf] %vm2186_vm0, %v3089_v57  ;;  %v2029_v61 = vpop.f32.mrb[52].mxu0  ;;  %v1838_v49 = vpop.f32.mrb[53].mxu1 }
 0x1cb   : > { %v3180_v5 = vadd.f32 %v2029_v61, %v1836_v59  ;;  %v2031_v51 = vpop.f32.mrb[53].mxu0  ;;  %v1840_v21 = vpop.f32.mrb[54].mxu1 }
 0x1cc   : > { %v3181_v52 = vadd.f32 %v2031_v51, %v1838_v49  ;;  %v2033_v54 = vpop.f32.mrb[54].mxu0  ;;  %v1842_v25 = vpop.f32.mrb[55].mxu1 }
 0x1cd   : > { %v3058_v56 = vpack.c.bf16 %v3180_v5, %v3180_v5  ;;  %v3182_v23 = vadd.f32 %v2033_v54, %v1840_v21  ;;  %v2035_v30 = vpop.f32.mrb[55].mxu0 }
 0x1ce   : > { %v3090_v63 = vpack.c.bf16 %v3181_v52, %v3181_v52  ;;  %v3183_v2 = vadd.f32 %v2035_v30, %v1842_v25 }
 0x1cf   : > { %2213 = vst.msk [vmem:[%s4134_s26 + $0x68] sm:$0xf] %vm2186_vm0, %v3058_v56  ;;  %v3059_v32 = vpack.c.bf16 %v3182_v23, %v3182_v23  ;;  %2271 = vrot.lane.b32.xlu0 %v3058_v56, %s3660_s29 }
 0x1d0   : > { %2501 = vst.msk [vmem:[%s4140_s28 + $0x68] sm:$0xf] %vm2186_vm0, %v3090_v63  ;;  %v3091_v58 = vpack.c.bf16 %v3183_v2, %v3183_v2 }
 0x1d1   : > { %2214 = vst.msk [vmem:[%s4134_s26 + $0x6c] sm:$0xf] %vm2186_vm0, %v3059_v32  ;;  %2273 = vrot.lane.b32.xlu1 %v3059_v32, %s3660_s29  ;;  %v1846_v60 = vpop.f32.mrb[56].mxu1 }
 0x1d2   : > { %2502 = vst.msk [vmem:[%s4140_s28 + $0x6c] sm:$0xf] %vm2186_vm0, %v3091_v58  ;;  %v2039_v62 = vpop.f32.mrb[56].mxu0  ;;  %v1848_v27 = vpop.f32.mrb[57].mxu1 }
 0x1d3   : > { %v3184_v0 = vadd.f32 %v2039_v62, %v1846_v60  ;;  %v2041_v4 = vpop.f32.mrb[57].mxu0  ;;  %v1850_v31 = vpop.f32.mrb[58].mxu1 }
 0x1d4   : > { %v3185_v29 = vadd.f32 %v2041_v4, %v1848_v27  ;;  %v2043_v7 = vpop.f32.mrb[58].mxu0  ;;  %v1852_v9 = vpop.f32.mrb[59].mxu1 }
 0x1d5   : > { %v3060_v34 = vpack.c.bf16 %v3184_v0, %v3184_v0  ;;  %v3186_v36 = vadd.f32 %v2043_v7, %v1850_v31  ;;  %v2045_v6 = vpop.f32.mrb[59].mxu0 }
 0x1d6   : > { %v3092_v8 = vpack.c.bf16 %v3185_v29, %v3185_v29  ;;  %v3187_v10 = vadd.f32 %v2045_v6, %v1852_v9 }
 0x1d7   : > { %2215 = vst.msk [vmem:[%s4134_s26 + $0x70] sm:$0xf] %vm2186_vm0, %v3060_v34  ;;  %v3061_v33 = vpack.c.bf16 %v3186_v36, %v3186_v36  ;;  %2275 = vrot.lane.b32.xlu0 %v3060_v34, %s3660_s29 }
 0x1d8   : > { %2503 = vst.msk [vmem:[%s4140_s28 + $0x70] sm:$0xf] %vm2186_vm0, %v3092_v8  ;;  %v3093_v12 = vpack.c.bf16 %v3187_v10, %v3187_v10 }
 0x1d9   : > { %2216 = vst.msk [vmem:[%s4134_s26 + $0x74] sm:$0xf] %vm2186_vm0, %v3061_v33  ;;  %v2220_v14 = vpop.permute.xlu0 %2219  ;;  %2277 = vrot.lane.b32.xlu1 %v3061_v33, %s3660_s29  ;;  %v1856_v35 = vpop.f32.mrb[60].mxu1 }
 0x1da   : > { %2504 = vst.msk [vmem:[%s4140_s28 + $0x74] sm:$0xf] %vm2186_vm0, %v3093_v12  ;;  %2315 = vst.msk [vmem:[%s4314_s6] sm:$0xf] %vm2186_vm0, %v2220_v14  ;;  %v2049_v37 = vpop.f32.mrb[60].mxu0  ;;  %v1858_v11 = vpop.f32.mrb[61].mxu1 }
 0x1db   : > { %v3188_v38 = vadd.f32 %v2049_v37, %v1856_v35  ;;  %v2051_v13 = vpop.f32.mrb[61].mxu0  ;;  %v1860_v16 = vpop.f32.mrb[62].mxu1 }
 0x1dc   : > { %v3189_v40 = vadd.f32 %v2051_v13, %v1858_v11  ;;  %v2053_v18 = vpop.f32.mrb[62].mxu0  ;;  %v1862_v41 = vpop.f32.mrb[63].mxu1 }
 0x1dd   : > { %v3062_v20 = vpack.c.bf16 %v3188_v38, %v3188_v38  ;;  %v3190_v22 = vadd.f32 %v2053_v18, %v1860_v16  ;;  %v2055_v39 = vpop.f32.mrb[63].mxu0  ;;  %v2222_v1 = vpop.permute.xlu0 %2221 }
 0x1de   : > { %v3094_v24 = vpack.c.bf16 %v3189_v40, %v3189_v40  ;;  %2316 = vst.msk [vmem:[%s4314_s6 + $0x4] sm:$0xf] %vm2186_vm0, %v2222_v1  ;;  %v3191_v44 = vadd.f32 %v2055_v39, %v1862_v41 }
 0x1df   : > { %2217 = vst.msk [vmem:[%s4134_s26 + $0x78] sm:$0xf] %vm2186_vm0, %v3062_v20  ;;  %v3063_v42 = vpack.c.bf16 %v3190_v22, %v3190_v22  ;;  %2279 = vrot.lane.b32.xlu0 %v3062_v20, %s3660_s29 }
 0x1e0   : > { %2505 = vst.msk [vmem:[%s4140_s28 + $0x78] sm:$0xf] %vm2186_vm0, %v3094_v24  ;;  %v3095_v46 = vpack.c.bf16 %v3191_v44, %v3191_v44 }
 0x1e1   : > { %2218 = vst.msk [vmem:[%s4134_s26 + $0x7c] sm:$0xf] %vm2186_vm0, %v3063_v42  ;;  %v2224_v43 = vpop.permute.xlu1 %2223  ;;  %2281 = vrot.lane.b32.xlu1 %v3063_v42, %s3660_s29 }
 0x1e2   : > { %2317 = vst.msk [vmem:[%s4314_s6 + $0x8] sm:$0xf] %vm2186_vm0, %v2224_v43  ;;  %2506 = vst.msk [vmem:[%s4140_s28 + $0x7c] sm:$0xf] %vm2186_vm0, %v3095_v46 }
 0x1e5   : > { %v2226_v15 = vpop.permute.xlu1 %2225 }
 0x1e6   : > { %2318 = vst.msk [vmem:[%s4314_s6 + $0xc] sm:$0xf] %vm2186_vm0, %v2226_v15 }
 0x1e9   : > { %v2228_v45 = vpop.permute.xlu0 %2227 }
 0x1ea   : > { %2319 = vst.msk [vmem:[%s4314_s6 + $0x10] sm:$0xf] %vm2186_vm0, %v2228_v45 }
 0x1eb   : > { %v2230_v26 = vpop.permute.xlu1 %2229 }
 0x1ec   : > { %2320 = vst.msk [vmem:[%s4314_s6 + $0x14] sm:$0xf] %vm2186_vm0, %v2230_v26 }
 0x1f1   : > { %v2232_v47 = vpop.permute.xlu0 %2231 }
 0x1f2   : > { %2321 = vst.msk [vmem:[%s4314_s6 + $0x18] sm:$0xf] %vm2186_vm0, %v2232_v47 }
 0x1f3   : > { %v2234_v3 = vpop.permute.xlu1 %2233 }
 0x1f4   : > { %2322 = vst.msk [vmem:[%s4314_s6 + $0x1c] sm:$0xf] %vm2186_vm0, %v2234_v3 }
 0x1f9   : > { %v2236_v50 = vpop.permute.xlu0 %2235 }
 0x1fa   : > { %2323 = vst.msk [vmem:[%s4314_s6 + $0x20] sm:$0xf] %vm2186_vm0, %v2236_v50 }
 0x1fb   : > { %v2238_v28 = vpop.permute.xlu1 %2237 }
 0x1fc   : > { %2324 = vst.msk [vmem:[%s4314_s6 + $0x24] sm:$0xf] %vm2186_vm0, %v2238_v28 }
 0x201   : > { %v2240_v53 = vpop.permute.xlu0 %2239 }
 0x202   : > { %2325 = vst.msk [vmem:[%s4314_s6 + $0x28] sm:$0xf] %vm2186_vm0, %v2240_v53 }
 0x203   : > { %v2242_v55 = vpop.permute.xlu1 %2241 }
 0x204   : > { %2326 = vst.msk [vmem:[%s4314_s6 + $0x2c] sm:$0xf] %vm2186_vm0, %v2242_v55 }
 0x209   : > { %v2244_v48 = vpop.permute.xlu0 %2243 }
 0x20a   : > { %2327 = vst.msk [vmem:[%s4314_s6 + $0x30] sm:$0xf] %vm2186_vm0, %v2244_v48 }
 0x20b   : > { %v2246_v17 = vpop.permute.xlu1 %2245 }
 0x20c   : > { %2328 = vst.msk [vmem:[%s4314_s6 + $0x34] sm:$0xf] %vm2186_vm0, %v2246_v17 }
 0x211   : > { %v2248_v19 = vpop.permute.xlu0 %2247 }
 0x212   : > { %2329 = vst.msk [vmem:[%s4314_s6 + $0x38] sm:$0xf] %vm2186_vm0, %v2248_v19 }
 0x213   : > { %v2250_v57 = vpop.permute.xlu1 %2249 }
 0x214   : > { %2330 = vst.msk [vmem:[%s4314_s6 + $0x3c] sm:$0xf] %vm2186_vm0, %v2250_v57 }
 0x219   : > { %v2252_v59 = vpop.permute.xlu0 %2251 }
 0x21a   : > { %2331 = vst.msk [vmem:[%s4314_s6 + $0x40] sm:$0xf] %vm2186_vm0, %v2252_v59 }
 0x21b   : > { %v2254_v61 = vpop.permute.xlu1 %2253 }
 0x21c   : > { %2332 = vst.msk [vmem:[%s4314_s6 + $0x44] sm:$0xf] %vm2186_vm0, %v2254_v61 }
 0x221   : > { %v2256_v5 = vpop.permute.xlu0 %2255 }
 0x222   : > { %2333 = vst.msk [vmem:[%s4314_s6 + $0x48] sm:$0xf] %vm2186_vm0, %v2256_v5 }
 0x223   : > { %v2258_v49 = vpop.permute.xlu1 %2257 }
 0x224   : > { %2334 = vst.msk [vmem:[%s4314_s6 + $0x4c] sm:$0xf] %vm2186_vm0, %v2258_v49 }
 0x229   : > { %v2260_v51 = vpop.permute.xlu0 %2259 }
 0x22a   : > { %2335 = vst.msk [vmem:[%s4314_s6 + $0x50] sm:$0xf] %vm2186_vm0, %v2260_v51 }
 0x22b   : > { %v2262_v52 = vpop.permute.xlu1 %2261 }
 0x22c   : > { %2336 = vst.msk [vmem:[%s4314_s6 + $0x54] sm:$0xf] %vm2186_vm0, %v2262_v52 }
 0x231   : > { %v2264_v21 = vpop.permute.xlu0 %2263 }
 0x232   : > { %2337 = vst.msk [vmem:[%s4314_s6 + $0x58] sm:$0xf] %vm2186_vm0, %v2264_v21 }
 0x233   : > { %v2266_v54 = vpop.permute.xlu1 %2265 }
 0x234   : > { %2338 = vst.msk [vmem:[%s4314_s6 + $0x5c] sm:$0xf] %vm2186_vm0, %v2266_v54 }
 0x239   : > { %v2268_v56 = vpop.permute.xlu0 %2267 }
 0x23a   : > { %2339 = vst.msk [vmem:[%s4314_s6 + $0x60] sm:$0xf] %vm2186_vm0, %v2268_v56 }
 0x23b   : > { %v2270_v23 = vpop.permute.xlu1 %2269 }
 0x23c   : > { %2340 = vst.msk [vmem:[%s4314_s6 + $0x64] sm:$0xf] %vm2186_vm0, %v2270_v23 }
 0x241   : > { %v2272_v25 = vpop.permute.xlu0 %2271 }
 0x242   : > { %2341 = vst.msk [vmem:[%s4314_s6 + $0x68] sm:$0xf] %vm2186_vm0, %v2272_v25 }
 0x243   : > { %v2274_v30 = vpop.permute.xlu1 %2273 }
 0x244   : > { %2342 = vst.msk [vmem:[%s4314_s6 + $0x6c] sm:$0xf] %vm2186_vm0, %v2274_v30 }
 0x249   : > { %v2276_v63 = vpop.permute.xlu0 %2275 }
 0x24a   : > { %2343 = vst.msk [vmem:[%s4314_s6 + $0x70] sm:$0xf] %vm2186_vm0, %v2276_v63 }
 0x24b   : > { %v2278_v2 = vpop.permute.xlu1 %2277 }
 0x24c   : > { %2344 = vst.msk [vmem:[%s4314_s6 + $0x74] sm:$0xf] %vm2186_vm0, %v2278_v2 }
 0x251   : > { %v2280_v32 = vpop.permute.xlu0 %2279 }
 0x252   : > { %2345 = vst.msk [vmem:[%s4314_s6 + $0x78] sm:$0xf] %vm2186_vm0, %v2280_v32 }
 0x253   : > { %v2282_v58 = vpop.permute.xlu1 %2281 }
 0x254   : > { %2346 = vst.msk [vmem:[%s4314_s6 + $0x7c] sm:$0xf] %vm2186_vm0, %v2282_v58 }
 0x255 PF: > { %s15_s21 = sadd.s32 1, %s3658_s21   ;;  %s4423_s15 = smov %s3646_s18 }
 0x256   : > { %p12_p9 = scmp.ge.s32.totalorder %s15_s21, 50   ;;  %s4424_s16 = smov %s3650_s19 }
 0x257   : > { %s4425_s17 = smov %s3654_s20  ;;  %s4426_s18 = smov %s4430_s22 }
 0x258   : > { %s4427_s19 = smov %s4434_s23  ;;  %s4428_s20 = smov %s4438_s24 }
 0x259   :  { %14 = sbr.rel (!%p12_p9) target bundleno = 4 (0x4), region = 83 }

</bundles_post_ra>
